<compile_context>
chip_gen: v6e
topology: v6e:2x2x1
jax: 0.10.0
libtpu: 0.0.40
codegen_flags: <defaults>
</compile_context>

<pallas_src>
import jax
import jax.numpy as jnp
from jax import lax
from jax.experimental import pallas as pl
from jax.experimental.pallas import tpu as pltpu


def lstm2_head_kernel(x_ref, wih0_ref, b0_ref, whh0_ref, wih1_ref, whh1_ref,
                      b1_ref, lastidx_ref, wh_ref, bh_ref, out_ref,
                      gx, h1, c1, h2, c2, last_h):
    """One time-chunk of the stacked 2-layer LSTM (+ fused head on last chunk).

    x_ref:       (tc*BP, E)   raw input chunk, time-major rows of BP
    wih0_ref:    (E, 4H)      layer-1 input->gates weights (transposed)
    b0_ref:      (1, 4H)      layer-1 combined bias
    whh0_ref:    (H, 4H)      layer-1 hidden->gates weights (transposed)
    wih1_ref:    (H, 4H)      layer-2 input->gates weights (transposed)
    whh1_ref:    (H, 4H)      layer-2 hidden->gates weights (transposed)
    b1_ref:      (1, 4H)      layer-2 combined bias
    lastidx_ref: (BP, 1) i32  per-row last valid timestep (lengths - 1)
    wh_ref:      (2H, 1)  bh_ref: (1, 1)   head weights
    out_ref:     (B, 1)       final predictions (resident across chunks)
    gx:          (tc*BP, 4H)  VMEM scratch: per-chunk input projection
    h1,c1,h2,c2,last_h: (BP, H)  VMEM state carried across grid steps
    """
    c = pl.program_id(0)
    nc = pl.num_programs(0)
    H = whh0_ref.shape[0]
    BP = h1.shape[0]
    TC = x_ref.shape[0] // BP

    @pl.when(c == 0)
    def _():
        h1[...] = jnp.zeros_like(h1)
        c1[...] = jnp.zeros_like(c1)
        h2[...] = jnp.zeros_like(h2)
        c2[...] = jnp.zeros_like(c2)
        last_h[...] = jnp.zeros_like(last_h)

    # Chunk-level layer-1 input projection: one (TC*BP, E) @ (E, 4H) MXU
    # matmul outside the serial recurrence; x streamed at E width, not 4H.
    gx[...] = (jnp.dot(x_ref[...], wih0_ref[...],
                       preferred_element_type=jnp.float32) + b0_ref[...])

    whh0 = whh0_ref[...]                 # hoisted (small, constant per chunk)
    wih1 = wih1_ref[...]
    whh1 = whh1_ref[...]
    b1 = b1_ref[...]
    last_idx = lastidx_ref[...]          # (BP, 1) int32
    t_base = c * TC

    def act(gates, c_prev):
        # gate order matches torch.nn.LSTM: i, f, g, o
        # sigmoid(x) = 0.5*tanh(0.5*x) + 0.5 -> one EUP push at full 4H width
        s = 0.5 * jnp.tanh(0.5 * gates) + 0.5       # valid lanes: i, f, o
        t = jnp.tanh(gates)                         # valid lanes: g
        i = s[:, 0 * H:1 * H]
        f = s[:, 1 * H:2 * H]
        g = t[:, 2 * H:3 * H]
        o = s[:, 3 * H:4 * H]
        c_new = f * c_prev + i * g
        h_new = o * jnp.tanh(c_new)
        return h_new, c_new

    def step(tt, carry):
        h1v, c1v, h2v, c2v, lhv = carry
        row = pl.multiple_of(tt * BP, BP)
        # layer 1: input projection precomputed; only the recurrent matmul
        gates1 = gx[pl.ds(row, BP), :] + jnp.dot(
            h1v, whh0, preferred_element_type=jnp.float32)
        h1n, c1n = act(gates1, c1v)
        # layer 2: two accumulating dots (no per-step lane concat)
        gates2 = (jnp.dot(h1n, wih1, preferred_element_type=jnp.float32)
                  + jnp.dot(h2v, whh1, preferred_element_type=jnp.float32)
                  + b1)
        h2n, c2n = act(gates2, c2v)
        # keep only the hidden state at t == lengths - 1
        sel = last_idx == (t_base + tt)              # (BP, 1)
        lhn = jnp.where(sel, h2n, lhv)
        return h1n, c1n, h2n, c2n, lhn

    carry = (h1[...], c1[...], h2[...], c2[...], last_h[...])
    h1n, c1n, h2n, c2n, lhn = lax.fori_loop(0, TC, step, carry, unroll=8)
    h1[...] = h1n
    c1[...] = c1n
    h2[...] = h2n
    c2[...] = c2n
    last_h[...] = lhn

    # Fused Linear(2H -> 1) head on the final chunk: every row's last-valid
    # hidden state has been captured by now. No lane concat: split the head
    # weight into its fwd / rev halves.
    @pl.when(c == nc - 1)
    def _():
        B = out_ref.shape[0]
        wh = wh_ref[...]
        out_ref[...] = (
            jnp.dot(lhn[0:B, :], wh[0:H, :],
                    preferred_element_type=jnp.float32)
            + jnp.dot(lhn[B:2 * B, :], wh[H:2 * H, :],
                      preferred_element_type=jnp.float32)
            + bh_ref[...])


def custom_lstm_forward(params, antigen, antigen_reversed, antigen_full, mask,
                        *, t_chunk=32):
    """Mirrors CustomLSTM.forward (eval mode). `antigen_full` is unused."""
    del antigen_full
    B, T, E = antigen.shape
    H = params["whh0"].shape[0]
    lengths = jnp.sum(mask, axis=1).astype(jnp.int32)             # (B,)

    # Stack forward + reversed sequences on the batch axis (one recurrence
    # serves both directions); pad rows up to a multiple of 8 sublanes.
    x = jnp.concatenate([antigen, antigen_reversed], axis=0).astype(jnp.float32)
    BP = max(8, ((2 * B + 7) // 8) * 8)
    if BP > 2 * B:
        x = jnp.pad(x, ((0, BP - 2 * B), (0, 0), (0, 0)))

    # Near-equal time chunks: zero-padded dead steps < n_chunks.
    n_chunks = pl.cdiv(T, min(t_chunk, T))
    tc = pl.cdiv(T, n_chunks)
    T_pad = n_chunks * tc

    # Time-major and flattened to (T_pad*BP, E): kernel streams x at E width
    # instead of the 4H-wide gx of the previous version.
    x_tm = jnp.transpose(x, (1, 0, 2))                            # (T, BP, E)
    if T_pad > T:
        x_tm = jnp.pad(x_tm, ((0, T_pad - T), (0, 0), (0, 0)))
    x_flat = x_tm.reshape(T_pad * BP, E)

    # Per stacked row: index of the last valid timestep (-1 => never selected,
    # used for the padded batch rows). Both directions gather at lengths-1,
    # matching the PyTorch reference.
    last_idx = jnp.full((BP, 1), -1, jnp.int32)
    last_idx = last_idx.at[0:B, 0].set(lengths - 1)
    last_idx = last_idx.at[B:2 * B, 0].set(lengths - 1)

    out = pl.pallas_call(
        lstm2_head_kernel,
        out_shape=jax.ShapeDtypeStruct((B, 1), jnp.float32),
        grid_spec=pltpu.PrefetchScalarGridSpec(
            num_scalar_prefetch=0,
            grid=(n_chunks,),
            in_specs=[
                pl.BlockSpec((tc * BP, E), lambda c: (c, 0)),      # x chunk
                pl.BlockSpec((E, 4 * H), lambda c: (0, 0)),        # wih0^T
                pl.BlockSpec((1, 4 * H), lambda c: (0, 0)),        # b0
                pl.BlockSpec((H, 4 * H), lambda c: (0, 0)),        # whh0^T
                pl.BlockSpec((H, 4 * H), lambda c: (0, 0)),        # wih1^T
                pl.BlockSpec((H, 4 * H), lambda c: (0, 0)),        # whh1^T
                pl.BlockSpec((1, 4 * H), lambda c: (0, 0)),        # b1
                pl.BlockSpec((BP, 1), lambda c: (0, 0)),           # last_idx
                pl.BlockSpec((2 * H, 1), lambda c: (0, 0)),        # w_head
                pl.BlockSpec((1, 1), lambda c: (0, 0)),            # b_head
            ],
            out_specs=pl.BlockSpec((B, 1), lambda c: (0, 0)),
            scratch_shapes=[pltpu.VMEM((tc * BP, 4 * H), jnp.float32)]   # gx
                          + [pltpu.VMEM((BP, H), jnp.float32)] * 5,      # state
        ),
        compiler_params=pltpu.CompilerParams(
            dimension_semantics=("arbitrary",),      # serial time recurrence
            vmem_limit_bytes=32 * 1024 * 1024),      # fits v5e/v6e/v7x budgets
    )(x_flat, params["wih0"], params["b0"], params["whh0"], params["wih1"],
      params["whh1"], params["b1"], last_idx, params["w_head"],
      params["b_head"])
    return jnp.squeeze(out, -1)                                    # (B,)


def init_params(key, E, H):
    """Deterministic PyTorch-style init; weights pre-transposed for x @ W."""
    klstm = 1.0 / float(H) ** 0.5
    khead = 1.0 / float(2 * H) ** 0.5
    ks = jax.random.split(key, 10)

    def u(k, shape, bound):
        return jax.random.uniform(k, shape, jnp.float32, -bound, bound)

    wih0 = u(ks[0], (4 * H, E), klstm)   # weight_ih_l0
    whh0 = u(ks[1], (4 * H, H), klstm)   # weight_hh_l0
    bih0 = u(ks[2], (4 * H,), klstm)
    bhh0 = u(ks[3], (4 * H,), klstm)
    wih1 = u(ks[4], (4 * H, H), klstm)   # weight_ih_l1
    whh1 = u(ks[5], (4 * H, H), klstm)   # weight_hh_l1
    bih1 = u(ks[6], (4 * H,), klstm)
    bhh1 = u(ks[7], (4 * H,), klstm)
    w_head = u(ks[8], (1, 2 * H), khead)
    b_head = u(ks[9], (1,), khead)

    return {
        "wih0": wih0.T,                   # (E, 4H)
        "whh0": whh0.T,                   # (H, 4H)
        "b0": (bih0 + bhh0)[None, :],     # (1, 4H)
        "wih1": wih1.T,                   # (H, 4H)
        "whh1": whh1.T,                   # (H, 4H)
        "b1": (bih1 + bhh1)[None, :],     # (1, 4H)
        "w_head": w_head.T,               # (2H, 1)
        "b_head": b_head[None, :],        # (1, 1)
    }


def _ref_forward(params, antigen, antigen_reversed, mask):
    """Pure-JAX reference (eval-mode nn.LSTM x2 + gather + concat + Linear)."""
    H = params["whh0"].shape[0]
    lengths = jnp.sum(mask, axis=1).astype(jnp.int32)

    def cell(h, c, gates):
        i = jax.nn.sigmoid(gates[:, 0:H])
        f = jax.nn.sigmoid(gates[:, H:2 * H])
        g = jnp.tanh(gates[:, 2 * H:3 * H])
        o = jax.nn.sigmoid(gates[:, 3 * H:4 * H])
        c = f * c + i * g
        return o * jnp.tanh(c), c

    def run(x):
        B, T, _ = x.shape
        h1 = jnp.zeros((B, H), jnp.float32)
        c1 = jnp.zeros((B, H), jnp.float32)
        h2 = jnp.zeros((B, H), jnp.float32)
        c2 = jnp.zeros((B, H), jnp.float32)
        outs = []
        for t in range(T):
            g1 = x[:, t] @ params["wih0"] + h1 @ params["whh0"] + params["b0"]
            h1, c1 = cell(h1, c1, g1)
            g2 = h1 @ params["wih1"] + h2 @ params["whh1"] + params["b1"]
            h2, c2 = cell(h2, c2, g2)
            outs.append(h2)
        return jnp.stack(outs, axis=1)

    b = jnp.arange(antigen.shape[0])
    o1 = run(antigen)[b, lengths - 1]
    o2 = run(antigen_reversed)[b, lengths - 1]
    cat = jnp.concatenate([o1, o2], axis=1)
    return (cat @ params["w_head"] + params["b_head"]).squeeze(-1)


if __name__ == "__main__":
    B, T, E, H = 2, 8, 16, 32
    key = jax.random.PRNGKey(0)
    kp, ka = jax.random.split(key, 2)

    params = init_params(kp, E, H)
    antigen = jax.random.normal(ka, (B, T, E), jnp.float32)
    antigen_reversed = antigen[:, ::-1, :]
    antigen_full = antigen                     # unused by the forward pass
    lengths = jnp.array([T, T - 3], jnp.int32)
    mask = (jnp.arange(T)[None, :] < lengths[:, None]).astype(jnp.float32)

    out = custom_lstm_forward(params, antigen, antigen_reversed, antigen_full,
                              mask)
    out = jax.block_until_ready(out)
    assert out.shape == (B,) and out.dtype == jnp.float32

    ref = _ref_forward(params, antigen, antigen_reversed, mask)
    assert jnp.allclose(out, ref, atol=2e-3, rtol=2e-3), (out, ref)
    print("KERNEL_OK")
</pallas_src>

<mosaic_0001>
module attributes {stable_mosaic.version = 11 : i64} {
  func.func @lstm2_head_kernel(%arg0: i32, %arg1: memref<64x16xf32, #tpu.memory_space<vmem>>, %arg2: memref<16x128xf32, #tpu.memory_space<vmem>>, %arg3: memref<1x128xf32, #tpu.memory_space<vmem>>, %arg4: memref<32x128xf32, #tpu.memory_space<vmem>>, %arg5: memref<32x128xf32, #tpu.memory_space<vmem>>, %arg6: memref<32x128xf32, #tpu.memory_space<vmem>>, %arg7: memref<1x128xf32, #tpu.memory_space<vmem>>, %arg8: memref<8x1xi32, #tpu.memory_space<vmem>>, %arg9: memref<64x1xf32, #tpu.memory_space<vmem>>, %arg10: memref<1x1xf32, #tpu.memory_space<vmem>>, %arg11: memref<2x1xf32, #tpu.memory_space<vmem>>, %arg12: memref<64x128xf32, #tpu.memory_space<vmem>>, %arg13: memref<8x32xf32, #tpu.memory_space<vmem>>, %arg14: memref<8x32xf32, #tpu.memory_space<vmem>>, %arg15: memref<8x32xf32, #tpu.memory_space<vmem>>, %arg16: memref<8x32xf32, #tpu.memory_space<vmem>>, %arg17: memref<8x32xf32, #tpu.memory_space<vmem>>) attributes {dimension_semantics = [#tpu.dimension_semantics<arbitrary>], iteration_bounds = array<i64: 1>, scalar_prefetch = 0 : i64, scratch_operands = 6 : i64, tpu.core_type = #tpu.core_type<tc>, window_params = [{transform_indices = @transform_0, window_bounds = array<i64: 64, 16>}, {pipeline_mode = #tpu.pipeline_mode<synchronous>, transform_indices = @transform_1, window_bounds = array<i64: 16, 128>}, {pipeline_mode = #tpu.pipeline_mode<synchronous>, transform_indices = @transform_2, window_bounds = array<i64: 1, 128>}, {pipeline_mode = #tpu.pipeline_mode<synchronous>, transform_indices = @transform_3, window_bounds = array<i64: 32, 128>}, {pipeline_mode = #tpu.pipeline_mode<synchronous>, transform_indices = @transform_4, window_bounds = array<i64: 32, 128>}, {pipeline_mode = #tpu.pipeline_mode<synchronous>, transform_indices = @transform_5, window_bounds = array<i64: 32, 128>}, {pipeline_mode = #tpu.pipeline_mode<synchronous>, transform_indices = @transform_6, window_bounds = array<i64: 1, 128>}, {pipeline_mode = #tpu.pipeline_mode<synchronous>, transform_indices = @transform_7, window_bounds = array<i64: 8, 1>}, {pipeline_mode = #tpu.pipeline_mode<synchronous>, transform_indices = @transform_8, window_bounds = array<i64: 64, 1>}, {pipeline_mode = #tpu.pipeline_mode<synchronous>, transform_indices = @transform_9, window_bounds = array<i64: 1, 1>}, {pipeline_mode = #tpu.pipeline_mode<synchronous>, transform_indices = @transform_10, window_bounds = array<i64: 2, 1>}]} {
    %c0_i32 = arith.constant 0 : i32
    %0 = arith.cmpi eq, %arg0, %c0_i32 : i32
    %1 = arith.extui %0 : i1 to i32
    %c0_i32_0 = arith.constant 0 : i32
    %2 = arith.cmpi ne, %1, %c0_i32_0 : i32
    scf.if %2 {
      %cst_130 = arith.constant 0.000000e+00 : f32
      %437 = vector.broadcast %cst_130 : f32 to vector<8x32xf32>
      %c0_131 = arith.constant 0 : index
      %c0_132 = arith.constant 0 : index
      %438 = vector.load %arg13[%c0_131, %c0_132] : memref<8x32xf32, #tpu.memory_space<vmem>>, vector<8x32xf32>
      tpu.vector_store %arg13[%c0_131, %c0_132], %437 {strides = array<i32>} : memref<8x32xf32, #tpu.memory_space<vmem>>, vector<8x32xf32>,
      %cst_133 = arith.constant 0.000000e+00 : f32
      %439 = vector.broadcast %cst_133 : f32 to vector<8x32xf32>
      %c0_134 = arith.constant 0 : index
      %c0_135 = arith.constant 0 : index
      %440 = vector.load %arg14[%c0_134, %c0_135] : memref<8x32xf32, #tpu.memory_space<vmem>>, vector<8x32xf32>
      tpu.vector_store %arg14[%c0_134, %c0_135], %439 {strides = array<i32>} : memref<8x32xf32, #tpu.memory_space<vmem>>, vector<8x32xf32>,
      %cst_136 = arith.constant 0.000000e+00 : f32
      %441 = vector.broadcast %cst_136 : f32 to vector<8x32xf32>
      %c0_137 = arith.constant 0 : index
      %c0_138 = arith.constant 0 : index
      %442 = vector.load %arg15[%c0_137, %c0_138] : memref<8x32xf32, #tpu.memory_space<vmem>>, vector<8x32xf32>
      tpu.vector_store %arg15[%c0_137, %c0_138], %441 {strides = array<i32>} : memref<8x32xf32, #tpu.memory_space<vmem>>, vector<8x32xf32>,
      %cst_139 = arith.constant 0.000000e+00 : f32
      %443 = vector.broadcast %cst_139 : f32 to vector<8x32xf32>
      %c0_140 = arith.constant 0 : index
      %c0_141 = arith.constant 0 : index
      %444 = vector.load %arg16[%c0_140, %c0_141] : memref<8x32xf32, #tpu.memory_space<vmem>>, vector<8x32xf32>
      tpu.vector_store %arg16[%c0_140, %c0_141], %443 {strides = array<i32>} : memref<8x32xf32, #tpu.memory_space<vmem>>, vector<8x32xf32>,
      %cst_142 = arith.constant 0.000000e+00 : f32
      %445 = vector.broadcast %cst_142 : f32 to vector<8x32xf32>
      %c0_143 = arith.constant 0 : index
      %c0_144 = arith.constant 0 : index
      %446 = vector.load %arg17[%c0_143, %c0_144] : memref<8x32xf32, #tpu.memory_space<vmem>>, vector<8x32xf32>
      tpu.vector_store %arg17[%c0_143, %c0_144], %445 {strides = array<i32>} : memref<8x32xf32, #tpu.memory_space<vmem>>, vector<8x32xf32>,
    } else {
    }
    %c0 = arith.constant 0 : index
    %c0_1 = arith.constant 0 : index
    %3 = vector.load %arg1[%c0, %c0_1] : memref<64x16xf32, #tpu.memory_space<vmem>>, vector<64x16xf32>
    %c0_2 = arith.constant 0 : index
    %c0_3 = arith.constant 0 : index
    %4 = vector.load %arg2[%c0_2, %c0_3] : memref<16x128xf32, #tpu.memory_space<vmem>>, vector<16x128xf32>
    %cst = arith.constant dense<0.000000e+00> : vector<64x128xf32>
    %5 = tpu.matmul %3, %4, %cst {dimension_numbers = #tpu.dot_dimension_numbers<[1], [0], [0], [1], [0, 0, 1, 1], [], []>} : vector<64x16xf32>, vector<16x128xf32>, vector<64x128xf32> -> vector<64x128xf32>
    %c0_4 = arith.constant 0 : index
    %c0_5 = arith.constant 0 : index
    %6 = vector.load %arg3[%c0_4, %c0_5] : memref<1x128xf32, #tpu.memory_space<vmem>>, vector<1x128xf32>
    %7 = vector.broadcast %6 : vector<1x128xf32> to vector<64x128xf32>
    %8 = arith.addf %5, %7 : vector<64x128xf32>
    %c0_6 = arith.constant 0 : index
    %c0_7 = arith.constant 0 : index
    %9 = vector.load %arg12[%c0_6, %c0_7] : memref<64x128xf32, #tpu.memory_space<vmem>>, vector<64x128xf32>
    tpu.vector_store %arg12[%c0_6, %c0_7], %8 {strides = array<i32>} : memref<64x128xf32, #tpu.memory_space<vmem>>, vector<64x128xf32>,
    %c0_8 = arith.constant 0 : index
    %c0_9 = arith.constant 0 : index
    %10 = vector.load %arg4[%c0_8, %c0_9] : memref<32x128xf32, #tpu.memory_space<vmem>>, vector<32x128xf32>
    %c0_10 = arith.constant 0 : index
    %c0_11 = arith.constant 0 : index
    %11 = vector.load %arg5[%c0_10, %c0_11] : memref<32x128xf32, #tpu.memory_space<vmem>>, vector<32x128xf32>
    %c0_12 = arith.constant 0 : index
    %c0_13 = arith.constant 0 : index
    %12 = vector.load %arg6[%c0_12, %c0_13] : memref<32x128xf32, #tpu.memory_space<vmem>>, vector<32x128xf32>
    %c0_14 = arith.constant 0 : index
    %c0_15 = arith.constant 0 : index
    %13 = vector.load %arg7[%c0_14, %c0_15] : memref<1x128xf32, #tpu.memory_space<vmem>>, vector<1x128xf32>
    %c0_16 = arith.constant 0 : index
    %c0_17 = arith.constant 0 : index
    %14 = vector.load %arg8[%c0_16, %c0_17] : memref<8x1xi32, #tpu.memory_space<vmem>>, vector<8x1xi32>
    %c8_i32 = arith.constant 8 : i32
    %15 = arith.muli %arg0, %c8_i32 : i32
    %c0_18 = arith.constant 0 : index
    %c0_19 = arith.constant 0 : index
    %16 = vector.load %arg13[%c0_18, %c0_19] : memref<8x32xf32, #tpu.memory_space<vmem>>, vector<8x32xf32>
    %c0_20 = arith.constant 0 : index
    %c0_21 = arith.constant 0 : index
    %17 = vector.load %arg14[%c0_20, %c0_21] : memref<8x32xf32, #tpu.memory_space<vmem>>, vector<8x32xf32>
    %c0_22 = arith.constant 0 : index
    %c0_23 = arith.constant 0 : index
    %18 = vector.load %arg15[%c0_22, %c0_23] : memref<8x32xf32, #tpu.memory_space<vmem>>, vector<8x32xf32>
    %c0_24 = arith.constant 0 : index
    %c0_25 = arith.constant 0 : index
    %19 = vector.load %arg16[%c0_24, %c0_25] : memref<8x32xf32, #tpu.memory_space<vmem>>, vector<8x32xf32>
    %c0_26 = arith.constant 0 : index
    %c0_27 = arith.constant 0 : index
    %20 = vector.load %arg17[%c0_26, %c0_27] : memref<8x32xf32, #tpu.memory_space<vmem>>, vector<8x32xf32>
    %c0_i32_28 = arith.constant 0 : i32
    %c8_i32_29 = arith.constant 8 : i32
    %21 = arith.muli %c0_i32_28, %c8_i32_29 : i32
    %22 = tpu.assume_multiple %21, 8 : i32
    %23 = arith.index_cast %22 : i32 to index
    %c0_30 = arith.constant 0 : index
    %24 = vector.load %arg12[%23, %c0_30] : memref<64x128xf32, #tpu.memory_space<vmem>>, vector<8x128xf32>
    %cst_31 = arith.constant dense<0.000000e+00> : vector<8x128xf32>
    %25 = tpu.matmul %16, %10, %cst_31 {dimension_numbers = #tpu.dot_dimension_numbers<[1], [0], [0], [1], [0, 0, 1, 1], [], []>} : vector<8x32xf32>, vector<32x128xf32>, vector<8x128xf32> -> vector<8x128xf32>
    %26 = arith.addf %24, %25 : vector<8x128xf32>
    %cst_32 = arith.constant 5.000000e-01 : f32
    %27 = vector.broadcast %cst_32 : f32 to vector<8x128xf32>
    %28 = arith.mulf %27, %26 : vector<8x128xf32>
    %29 = math.tanh %28 : vector<8x128xf32>
    %cst_33 = arith.constant 5.000000e-01 : f32
    %30 = vector.broadcast %cst_33 : f32 to vector<8x128xf32>
    %31 = arith.mulf %30, %29 : vector<8x128xf32>
    %cst_34 = arith.constant 5.000000e-01 : f32
    %32 = vector.broadcast %cst_34 : f32 to vector<8x128xf32>
    %33 = arith.addf %31, %32 : vector<8x128xf32>
    %34 = math.tanh %26 : vector<8x128xf32>
    %35 = vector.extract_strided_slice %33 {offsets = [0, 0], sizes = [8, 32], strides = [1, 1]} : vector<8x128xf32> to vector<8x32xf32>
    %36 = vector.extract_strided_slice %33 {offsets = [0, 32], sizes = [8, 32], strides = [1, 1]} : vector<8x128xf32> to vector<8x32xf32>
    %37 = vector.extract_strided_slice %34 {offsets = [0, 64], sizes = [8, 32], strides = [1, 1]} : vector<8x128xf32> to vector<8x32xf32>
    %38 = vector.extract_strided_slice %33 {offsets = [0, 96], sizes = [8, 32], strides = [1, 1]} : vector<8x128xf32> to vector<8x32xf32>
    %39 = arith.mulf %36, %17 : vector<8x32xf32>
    %40 = arith.mulf %35, %37 : vector<8x32xf32>
    %41 = arith.addf %39, %40 : vector<8x32xf32>
    %42 = math.tanh %41 : vector<8x32xf32>
    %43 = arith.mulf %38, %42 : vector<8x32xf32>
    %cst_35 = arith.constant dense<0.000000e+00> : vector<8x128xf32>
    %44 = tpu.matmul %43, %11, %cst_35 {dimension_numbers = #tpu.dot_dimension_numbers<[1], [0], [0], [1], [0, 0, 1, 1], [], []>} : vector<8x32xf32>, vector<32x128xf32>, vector<8x128xf32> -> vector<8x128xf32>
    %cst_36 = arith.constant dense<0.000000e+00> : vector<8x128xf32>
    %45 = tpu.matmul %18, %12, %cst_36 {dimension_numbers = #tpu.dot_dimension_numbers<[1], [0], [0], [1], [0, 0, 1, 1], [], []>} : vector<8x32xf32>, vector<32x128xf32>, vector<8x128xf32> -> vector<8x128xf32>
    %46 = arith.addf %44, %45 : vector<8x128xf32>
    %47 = vector.broadcast %13 : vector<1x128xf32> to vector<8x128xf32>
    %48 = arith.addf %46, %47 : vector<8x128xf32>
    %cst_37 = arith.constant 5.000000e-01 : f32
    %49 = vector.broadcast %cst_37 : f32 to vector<8x128xf32>
    %50 = arith.mulf %49, %48 : vector<8x128xf32>
    %51 = math.tanh %50 : vector<8x128xf32>
    %cst_38 = arith.constant 5.000000e-01 : f32
    %52 = vector.broadcast %cst_38 : f32 to vector<8x128xf32>
    %53 = arith.mulf %52, %51 : vector<8x128xf32>
    %cst_39 = arith.constant 5.000000e-01 : f32
    %54 = vector.broadcast %cst_39 : f32 to vector<8x128xf32>
    %55 = arith.addf %53, %54 : vector<8x128xf32>
    %56 = math.tanh %48 : vector<8x128xf32>
    %57 = vector.extract_strided_slice %55 {offsets = [0, 0], sizes = [8, 32], strides = [1, 1]} : vector<8x128xf32> to vector<8x32xf32>
    %58 = vector.extract_strided_slice %55 {offsets = [0, 32], sizes = [8, 32], strides = [1, 1]} : vector<8x128xf32> to vector<8x32xf32>
    %59 = vector.extract_strided_slice %56 {offsets = [0, 64], sizes = [8, 32], strides = [1, 1]} : vector<8x128xf32> to vector<8x32xf32>
    %60 = vector.extract_strided_slice %55 {offsets = [0, 96], sizes = [8, 32], strides = [1, 1]} : vector<8x128xf32> to vector<8x32xf32>
    %61 = arith.mulf %58, %19 : vector<8x32xf32>
    %62 = arith.mulf %57, %59 : vector<8x32xf32>
    %63 = arith.addf %61, %62 : vector<8x32xf32>
    %64 = math.tanh %63 : vector<8x32xf32>
    %65 = arith.mulf %60, %64 : vector<8x32xf32>
    %66 = arith.addi %15, %c0_i32_28 : i32
    %67 = vector.broadcast %66 : i32 to vector<8x1xi32>
    %68 = arith.cmpi eq, %14, %67 : vector<8x1xi32>
    %69 = vector.shape_cast %68 : vector<8x1xi1> to vector<8x1xi1>
    %70 = vector.broadcast %69 : vector<8x1xi1> to vector<8x32xi1>
    %71 = arith.select %70, %65, %20 : vector<8x32xi1>, vector<8x32xf32>
    %c1_i32 = arith.constant 1 : i32
    %c8_i32_40 = arith.constant 8 : i32
    %72 = arith.muli %c1_i32, %c8_i32_40 : i32
    %73 = tpu.assume_multiple %72, 8 : i32
    %74 = arith.index_cast %73 : i32 to index
    %c0_41 = arith.constant 0 : index
    %75 = vector.load %arg12[%74, %c0_41] : memref<64x128xf32, #tpu.memory_space<vmem>>, vector<8x128xf32>
    %cst_42 = arith.constant dense<0.000000e+00> : vector<8x128xf32>
    %76 = tpu.matmul %43, %10, %cst_42 {dimension_numbers = #tpu.dot_dimension_numbers<[1], [0], [0], [1], [0, 0, 1, 1], [], []>} : vector<8x32xf32>, vector<32x128xf32>, vector<8x128xf32> -> vector<8x128xf32>
    %77 = arith.addf %75, %76 : vector<8x128xf32>
    %cst_43 = arith.constant 5.000000e-01 : f32
    %78 = vector.broadcast %cst_43 : f32 to vector<8x128xf32>
    %79 = arith.mulf %78, %77 : vector<8x128xf32>
    %80 = math.tanh %79 : vector<8x128xf32>
    %cst_44 = arith.constant 5.000000e-01 : f32
    %81 = vector.broadcast %cst_44 : f32 to vector<8x128xf32>
    %82 = arith.mulf %81, %80 : vector<8x128xf32>
    %cst_45 = arith.constant 5.000000e-01 : f32
    %83 = vector.broadcast %cst_45 : f32 to vector<8x128xf32>
    %84 = arith.addf %82, %83 : vector<8x128xf32>
    %85 = math.tanh %77 : vector<8x128xf32>
    %86 = vector.extract_strided_slice %84 {offsets = [0, 0], sizes = [8, 32], strides = [1, 1]} : vector<8x128xf32> to vector<8x32xf32>
    %87 = vector.extract_strided_slice %84 {offsets = [0, 32], sizes = [8, 32], strides = [1, 1]} : vector<8x128xf32> to vector<8x32xf32>
    %88 = vector.extract_strided_slice %85 {offsets = [0, 64], sizes = [8, 32], strides = [1, 1]} : vector<8x128xf32> to vector<8x32xf32>
    %89 = vector.extract_strided_slice %84 {offsets = [0, 96], sizes = [8, 32], strides = [1, 1]} : vector<8x128xf32> to vector<8x32xf32>
    %90 = arith.mulf %87, %41 : vector<8x32xf32>
    %91 = arith.mulf %86, %88 : vector<8x32xf32>
    %92 = arith.addf %90, %91 : vector<8x32xf32>
    %93 = math.tanh %92 : vector<8x32xf32>
    %94 = arith.mulf %89, %93 : vector<8x32xf32>
    %cst_46 = arith.constant dense<0.000000e+00> : vector<8x128xf32>
    %95 = tpu.matmul %94, %11, %cst_46 {dimension_numbers = #tpu.dot_dimension_numbers<[1], [0], [0], [1], [0, 0, 1, 1], [], []>} : vector<8x32xf32>, vector<32x128xf32>, vector<8x128xf32> -> vector<8x128xf32>
    %cst_47 = arith.constant dense<0.000000e+00> : vector<8x128xf32>
    %96 = tpu.matmul %65, %12, %cst_47 {dimension_numbers = #tpu.dot_dimension_numbers<[1], [0], [0], [1], [0, 0, 1, 1], [], []>} : vector<8x32xf32>, vector<32x128xf32>, vector<8x128xf32> -> vector<8x128xf32>
    %97 = arith.addf %95, %96 : vector<8x128xf32>
    %98 = vector.broadcast %13 : vector<1x128xf32> to vector<8x128xf32>
    %99 = arith.addf %97, %98 : vector<8x128xf32>
    %cst_48 = arith.constant 5.000000e-01 : f32
    %100 = vector.broadcast %cst_48 : f32 to vector<8x128xf32>
    %101 = arith.mulf %100, %99 : vector<8x128xf32>
    %102 = math.tanh %101 : vector<8x128xf32>
    %cst_49 = arith.constant 5.000000e-01 : f32
    %103 = vector.broadcast %cst_49 : f32 to vector<8x128xf32>
    %104 = arith.mulf %103, %102 : vector<8x128xf32>
    %cst_50 = arith.constant 5.000000e-01 : f32
    %105 = vector.broadcast %cst_50 : f32 to vector<8x128xf32>
    %106 = arith.addf %104, %105 : vector<8x128xf32>
    %107 = math.tanh %99 : vector<8x128xf32>
    %108 = vector.extract_strided_slice %106 {offsets = [0, 0], sizes = [8, 32], strides = [1, 1]} : vector<8x128xf32> to vector<8x32xf32>
    %109 = vector.extract_strided_slice %106 {offsets = [0, 32], sizes = [8, 32], strides = [1, 1]} : vector<8x128xf32> to vector<8x32xf32>
    %110 = vector.extract_strided_slice %107 {offsets = [0, 64], sizes = [8, 32], strides = [1, 1]} : vector<8x128xf32> to vector<8x32xf32>
    %111 = vector.extract_strided_slice %106 {offsets = [0, 96], sizes = [8, 32], strides = [1, 1]} : vector<8x128xf32> to vector<8x32xf32>
    %112 = arith.mulf %109, %63 : vector<8x32xf32>
    %113 = arith.mulf %108, %110 : vector<8x32xf32>
    %114 = arith.addf %112, %113 : vector<8x32xf32>
    %115 = math.tanh %114 : vector<8x32xf32>
    %116 = arith.mulf %111, %115 : vector<8x32xf32>
    %117 = arith.addi %15, %c1_i32 : i32
    %118 = vector.broadcast %117 : i32 to vector<8x1xi32>
    %119 = arith.cmpi eq, %14, %118 : vector<8x1xi32>
    %120 = vector.shape_cast %119 : vector<8x1xi1> to vector<8x1xi1>
    %121 = vector.broadcast %120 : vector<8x1xi1> to vector<8x32xi1>
    %122 = arith.select %121, %116, %71 : vector<8x32xi1>, vector<8x32xf32>
    %c2_i32 = arith.constant 2 : i32
    %c8_i32_51 = arith.constant 8 : i32
    %123 = arith.muli %c2_i32, %c8_i32_51 : i32
    %124 = tpu.assume_multiple %123, 8 : i32
    %125 = arith.index_cast %124 : i32 to index
    %c0_52 = arith.constant 0 : index
    %126 = vector.load %arg12[%125, %c0_52] : memref<64x128xf32, #tpu.memory_space<vmem>>, vector<8x128xf32>
    %cst_53 = arith.constant dense<0.000000e+00> : vector<8x128xf32>
    %127 = tpu.matmul %94, %10, %cst_53 {dimension_numbers = #tpu.dot_dimension_numbers<[1], [0], [0], [1], [0, 0, 1, 1], [], []>} : vector<8x32xf32>, vector<32x128xf32>, vector<8x128xf32> -> vector<8x128xf32>
    %128 = arith.addf %126, %127 : vector<8x128xf32>
    %cst_54 = arith.constant 5.000000e-01 : f32
    %129 = vector.broadcast %cst_54 : f32 to vector<8x128xf32>
    %130 = arith.mulf %129, %128 : vector<8x128xf32>
    %131 = math.tanh %130 : vector<8x128xf32>
    %cst_55 = arith.constant 5.000000e-01 : f32
    %132 = vector.broadcast %cst_55 : f32 to vector<8x128xf32>
    %133 = arith.mulf %132, %131 : vector<8x128xf32>
    %cst_56 = arith.constant 5.000000e-01 : f32
    %134 = vector.broadcast %cst_56 : f32 to vector<8x128xf32>
    %135 = arith.addf %133, %134 : vector<8x128xf32>
    %136 = math.tanh %128 : vector<8x128xf32>
    %137 = vector.extract_strided_slice %135 {offsets = [0, 0], sizes = [8, 32], strides = [1, 1]} : vector<8x128xf32> to vector<8x32xf32>
    %138 = vector.extract_strided_slice %135 {offsets = [0, 32], sizes = [8, 32], strides = [1, 1]} : vector<8x128xf32> to vector<8x32xf32>
    %139 = vector.extract_strided_slice %136 {offsets = [0, 64], sizes = [8, 32], strides = [1, 1]} : vector<8x128xf32> to vector<8x32xf32>
    %140 = vector.extract_strided_slice %135 {offsets = [0, 96], sizes = [8, 32], strides = [1, 1]} : vector<8x128xf32> to vector<8x32xf32>
    %141 = arith.mulf %138, %92 : vector<8x32xf32>
    %142 = arith.mulf %137, %139 : vector<8x32xf32>
    %143 = arith.addf %141, %142 : vector<8x32xf32>
    %144 = math.tanh %143 : vector<8x32xf32>
    %145 = arith.mulf %140, %144 : vector<8x32xf32>
    %cst_57 = arith.constant dense<0.000000e+00> : vector<8x128xf32>
    %146 = tpu.matmul %145, %11, %cst_57 {dimension_numbers = #tpu.dot_dimension_numbers<[1], [0], [0], [1], [0, 0, 1, 1], [], []>} : vector<8x32xf32>, vector<32x128xf32>, vector<8x128xf32> -> vector<8x128xf32>
    %cst_58 = arith.constant dense<0.000000e+00> : vector<8x128xf32>
    %147 = tpu.matmul %116, %12, %cst_58 {dimension_numbers = #tpu.dot_dimension_numbers<[1], [0], [0], [1], [0, 0, 1, 1], [], []>} : vector<8x32xf32>, vector<32x128xf32>, vector<8x128xf32> -> vector<8x128xf32>
    %148 = arith.addf %146, %147 : vector<8x128xf32>
    %149 = vector.broadcast %13 : vector<1x128xf32> to vector<8x128xf32>
    %150 = arith.addf %148, %149 : vector<8x128xf32>
    %cst_59 = arith.constant 5.000000e-01 : f32
    %151 = vector.broadcast %cst_59 : f32 to vector<8x128xf32>
    %152 = arith.mulf %151, %150 : vector<8x128xf32>
    %153 = math.tanh %152 : vector<8x128xf32>
    %cst_60 = arith.constant 5.000000e-01 : f32
    %154 = vector.broadcast %cst_60 : f32 to vector<8x128xf32>
    %155 = arith.mulf %154, %153 : vector<8x128xf32>
    %cst_61 = arith.constant 5.000000e-01 : f32
    %156 = vector.broadcast %cst_61 : f32 to vector<8x128xf32>
    %157 = arith.addf %155, %156 : vector<8x128xf32>
    %158 = math.tanh %150 : vector<8x128xf32>
    %159 = vector.extract_strided_slice %157 {offsets = [0, 0], sizes = [8, 32], strides = [1, 1]} : vector<8x128xf32> to vector<8x32xf32>
    %160 = vector.extract_strided_slice %157 {offsets = [0, 32], sizes = [8, 32], strides = [1, 1]} : vector<8x128xf32> to vector<8x32xf32>
    %161 = vector.extract_strided_slice %158 {offsets = [0, 64], sizes = [8, 32], strides = [1, 1]} : vector<8x128xf32> to vector<8x32xf32>
    %162 = vector.extract_strided_slice %157 {offsets = [0, 96], sizes = [8, 32], strides = [1, 1]} : vector<8x128xf32> to vector<8x32xf32>
    %163 = arith.mulf %160, %114 : vector<8x32xf32>
    %164 = arith.mulf %159, %161 : vector<8x32xf32>
    %165 = arith.addf %163, %164 : vector<8x32xf32>
    %166 = math.tanh %165 : vector<8x32xf32>
    %167 = arith.mulf %162, %166 : vector<8x32xf32>
    %168 = arith.addi %15, %c2_i32 : i32
    %169 = vector.broadcast %168 : i32 to vector<8x1xi32>
    %170 = arith.cmpi eq, %14, %169 : vector<8x1xi32>
    %171 = vector.shape_cast %170 : vector<8x1xi1> to vector<8x1xi1>
    %172 = vector.broadcast %171 : vector<8x1xi1> to vector<8x32xi1>
    %173 = arith.select %172, %167, %122 : vector<8x32xi1>, vector<8x32xf32>
    %c3_i32 = arith.constant 3 : i32
    %c8_i32_62 = arith.constant 8 : i32
    %174 = arith.muli %c3_i32, %c8_i32_62 : i32
    %175 = tpu.assume_multiple %174, 8 : i32
    %176 = arith.index_cast %175 : i32 to index
    %c0_63 = arith.constant 0 : index
    %177 = vector.load %arg12[%176, %c0_63] : memref<64x128xf32, #tpu.memory_space<vmem>>, vector<8x128xf32>
    %cst_64 = arith.constant dense<0.000000e+00> : vector<8x128xf32>
    %178 = tpu.matmul %145, %10, %cst_64 {dimension_numbers = #tpu.dot_dimension_numbers<[1], [0], [0], [1], [0, 0, 1, 1], [], []>} : vector<8x32xf32>, vector<32x128xf32>, vector<8x128xf32> -> vector<8x128xf32>
    %179 = arith.addf %177, %178 : vector<8x128xf32>
    %cst_65 = arith.constant 5.000000e-01 : f32
    %180 = vector.broadcast %cst_65 : f32 to vector<8x128xf32>
    %181 = arith.mulf %180, %179 : vector<8x128xf32>
    %182 = math.tanh %181 : vector<8x128xf32>
    %cst_66 = arith.constant 5.000000e-01 : f32
    %183 = vector.broadcast %cst_66 : f32 to vector<8x128xf32>
    %184 = arith.mulf %183, %182 : vector<8x128xf32>
    %cst_67 = arith.constant 5.000000e-01 : f32
    %185 = vector.broadcast %cst_67 : f32 to vector<8x128xf32>
    %186 = arith.addf %184, %185 : vector<8x128xf32>
    %187 = math.tanh %179 : vector<8x128xf32>
    %188 = vector.extract_strided_slice %186 {offsets = [0, 0], sizes = [8, 32], strides = [1, 1]} : vector<8x128xf32> to vector<8x32xf32>
    %189 = vector.extract_strided_slice %186 {offsets = [0, 32], sizes = [8, 32], strides = [1, 1]} : vector<8x128xf32> to vector<8x32xf32>
    %190 = vector.extract_strided_slice %187 {offsets = [0, 64], sizes = [8, 32], strides = [1, 1]} : vector<8x128xf32> to vector<8x32xf32>
    %191 = vector.extract_strided_slice %186 {offsets = [0, 96], sizes = [8, 32], strides = [1, 1]} : vector<8x128xf32> to vector<8x32xf32>
    %192 = arith.mulf %189, %143 : vector<8x32xf32>
    %193 = arith.mulf %188, %190 : vector<8x32xf32>
    %194 = arith.addf %192, %193 : vector<8x32xf32>
    %195 = math.tanh %194 : vector<8x32xf32>
    %196 = arith.mulf %191, %195 : vector<8x32xf32>
    %cst_68 = arith.constant dense<0.000000e+00> : vector<8x128xf32>
    %197 = tpu.matmul %196, %11, %cst_68 {dimension_numbers = #tpu.dot_dimension_numbers<[1], [0], [0], [1], [0, 0, 1, 1], [], []>} : vector<8x32xf32>, vector<32x128xf32>, vector<8x128xf32> -> vector<8x128xf32>
    %cst_69 = arith.constant dense<0.000000e+00> : vector<8x128xf32>
    %198 = tpu.matmul %167, %12, %cst_69 {dimension_numbers = #tpu.dot_dimension_numbers<[1], [0], [0], [1], [0, 0, 1, 1], [], []>} : vector<8x32xf32>, vector<32x128xf32>, vector<8x128xf32> -> vector<8x128xf32>
    %199 = arith.addf %197, %198 : vector<8x128xf32>
    %200 = vector.broadcast %13 : vector<1x128xf32> to vector<8x128xf32>
    %201 = arith.addf %199, %200 : vector<8x128xf32>
    %cst_70 = arith.constant 5.000000e-01 : f32
    %202 = vector.broadcast %cst_70 : f32 to vector<8x128xf32>
    %203 = arith.mulf %202, %201 : vector<8x128xf32>
    %204 = math.tanh %203 : vector<8x128xf32>
    %cst_71 = arith.constant 5.000000e-01 : f32
    %205 = vector.broadcast %cst_71 : f32 to vector<8x128xf32>
    %206 = arith.mulf %205, %204 : vector<8x128xf32>
    %cst_72 = arith.constant 5.000000e-01 : f32
    %207 = vector.broadcast %cst_72 : f32 to vector<8x128xf32>
    %208 = arith.addf %206, %207 : vector<8x128xf32>
    %209 = math.tanh %201 : vector<8x128xf32>
    %210 = vector.extract_strided_slice %208 {offsets = [0, 0], sizes = [8, 32], strides = [1, 1]} : vector<8x128xf32> to vector<8x32xf32>
    %211 = vector.extract_strided_slice %208 {offsets = [0, 32], sizes = [8, 32], strides = [1, 1]} : vector<8x128xf32> to vector<8x32xf32>
    %212 = vector.extract_strided_slice %209 {offsets = [0, 64], sizes = [8, 32], strides = [1, 1]} : vector<8x128xf32> to vector<8x32xf32>
    %213 = vector.extract_strided_slice %208 {offsets = [0, 96], sizes = [8, 32], strides = [1, 1]} : vector<8x128xf32> to vector<8x32xf32>
    %214 = arith.mulf %211, %165 : vector<8x32xf32>
    %215 = arith.mulf %210, %212 : vector<8x32xf32>
    %216 = arith.addf %214, %215 : vector<8x32xf32>
    %217 = math.tanh %216 : vector<8x32xf32>
    %218 = arith.mulf %213, %217 : vector<8x32xf32>
    %219 = arith.addi %15, %c3_i32 : i32
    %220 = vector.broadcast %219 : i32 to vector<8x1xi32>
    %221 = arith.cmpi eq, %14, %220 : vector<8x1xi32>
    %222 = vector.shape_cast %221 : vector<8x1xi1> to vector<8x1xi1>
    %223 = vector.broadcast %222 : vector<8x1xi1> to vector<8x32xi1>
    %224 = arith.select %223, %218, %173 : vector<8x32xi1>, vector<8x32xf32>
    %c4_i32 = arith.constant 4 : i32
    %c8_i32_73 = arith.constant 8 : i32
    %225 = arith.muli %c4_i32, %c8_i32_73 : i32
    %226 = tpu.assume_multiple %225, 8 : i32
    %227 = arith.index_cast %226 : i32 to index
    %c0_74 = arith.constant 0 : index
    %228 = vector.load %arg12[%227, %c0_74] : memref<64x128xf32, #tpu.memory_space<vmem>>, vector<8x128xf32>
    %cst_75 = arith.constant dense<0.000000e+00> : vector<8x128xf32>
    %229 = tpu.matmul %196, %10, %cst_75 {dimension_numbers = #tpu.dot_dimension_numbers<[1], [0], [0], [1], [0, 0, 1, 1], [], []>} : vector<8x32xf32>, vector<32x128xf32>, vector<8x128xf32> -> vector<8x128xf32>
    %230 = arith.addf %228, %229 : vector<8x128xf32>
    %cst_76 = arith.constant 5.000000e-01 : f32
    %231 = vector.broadcast %cst_76 : f32 to vector<8x128xf32>
    %232 = arith.mulf %231, %230 : vector<8x128xf32>
    %233 = math.tanh %232 : vector<8x128xf32>
    %cst_77 = arith.constant 5.000000e-01 : f32
    %234 = vector.broadcast %cst_77 : f32 to vector<8x128xf32>
    %235 = arith.mulf %234, %233 : vector<8x128xf32>
    %cst_78 = arith.constant 5.000000e-01 : f32
    %236 = vector.broadcast %cst_78 : f32 to vector<8x128xf32>
    %237 = arith.addf %235, %236 : vector<8x128xf32>
    %238 = math.tanh %230 : vector<8x128xf32>
    %239 = vector.extract_strided_slice %237 {offsets = [0, 0], sizes = [8, 32], strides = [1, 1]} : vector<8x128xf32> to vector<8x32xf32>
    %240 = vector.extract_strided_slice %237 {offsets = [0, 32], sizes = [8, 32], strides = [1, 1]} : vector<8x128xf32> to vector<8x32xf32>
    %241 = vector.extract_strided_slice %238 {offsets = [0, 64], sizes = [8, 32], strides = [1, 1]} : vector<8x128xf32> to vector<8x32xf32>
    %242 = vector.extract_strided_slice %237 {offsets = [0, 96], sizes = [8, 32], strides = [1, 1]} : vector<8x128xf32> to vector<8x32xf32>
    %243 = arith.mulf %240, %194 : vector<8x32xf32>
    %244 = arith.mulf %239, %241 : vector<8x32xf32>
    %245 = arith.addf %243, %244 : vector<8x32xf32>
    %246 = math.tanh %245 : vector<8x32xf32>
    %247 = arith.mulf %242, %246 : vector<8x32xf32>
    %cst_79 = arith.constant dense<0.000000e+00> : vector<8x128xf32>
    %248 = tpu.matmul %247, %11, %cst_79 {dimension_numbers = #tpu.dot_dimension_numbers<[1], [0], [0], [1], [0, 0, 1, 1], [], []>} : vector<8x32xf32>, vector<32x128xf32>, vector<8x128xf32> -> vector<8x128xf32>
    %cst_80 = arith.constant dense<0.000000e+00> : vector<8x128xf32>
    %249 = tpu.matmul %218, %12, %cst_80 {dimension_numbers = #tpu.dot_dimension_numbers<[1], [0], [0], [1], [0, 0, 1, 1], [], []>} : vector<8x32xf32>, vector<32x128xf32>, vector<8x128xf32> -> vector<8x128xf32>
    %250 = arith.addf %248, %249 : vector<8x128xf32>
    %251 = vector.broadcast %13 : vector<1x128xf32> to vector<8x128xf32>
    %252 = arith.addf %250, %251 : vector<8x128xf32>
    %cst_81 = arith.constant 5.000000e-01 : f32
    %253 = vector.broadcast %cst_81 : f32 to vector<8x128xf32>
    %254 = arith.mulf %253, %252 : vector<8x128xf32>
    %255 = math.tanh %254 : vector<8x128xf32>
    %cst_82 = arith.constant 5.000000e-01 : f32
    %256 = vector.broadcast %cst_82 : f32 to vector<8x128xf32>
    %257 = arith.mulf %256, %255 : vector<8x128xf32>
    %cst_83 = arith.constant 5.000000e-01 : f32
    %258 = vector.broadcast %cst_83 : f32 to vector<8x128xf32>
    %259 = arith.addf %257, %258 : vector<8x128xf32>
    %260 = math.tanh %252 : vector<8x128xf32>
    %261 = vector.extract_strided_slice %259 {offsets = [0, 0], sizes = [8, 32], strides = [1, 1]} : vector<8x128xf32> to vector<8x32xf32>
    %262 = vector.extract_strided_slice %259 {offsets = [0, 32], sizes = [8, 32], strides = [1, 1]} : vector<8x128xf32> to vector<8x32xf32>
    %263 = vector.extract_strided_slice %260 {offsets = [0, 64], sizes = [8, 32], strides = [1, 1]} : vector<8x128xf32> to vector<8x32xf32>
    %264 = vector.extract_strided_slice %259 {offsets = [0, 96], sizes = [8, 32], strides = [1, 1]} : vector<8x128xf32> to vector<8x32xf32>
    %265 = arith.mulf %262, %216 : vector<8x32xf32>
    %266 = arith.mulf %261, %263 : vector<8x32xf32>
    %267 = arith.addf %265, %266 : vector<8x32xf32>
    %268 = math.tanh %267 : vector<8x32xf32>
    %269 = arith.mulf %264, %268 : vector<8x32xf32>
    %270 = arith.addi %15, %c4_i32 : i32
    %271 = vector.broadcast %270 : i32 to vector<8x1xi32>
    %272 = arith.cmpi eq, %14, %271 : vector<8x1xi32>
    %273 = vector.shape_cast %272 : vector<8x1xi1> to vector<8x1xi1>
    %274 = vector.broadcast %273 : vector<8x1xi1> to vector<8x32xi1>
    %275 = arith.select %274, %269, %224 : vector<8x32xi1>, vector<8x32xf32>
    %c5_i32 = arith.constant 5 : i32
    %c8_i32_84 = arith.constant 8 : i32
    %276 = arith.muli %c5_i32, %c8_i32_84 : i32
    %277 = tpu.assume_multiple %276, 8 : i32
    %278 = arith.index_cast %277 : i32 to index
    %c0_85 = arith.constant 0 : index
    %279 = vector.load %arg12[%278, %c0_85] : memref<64x128xf32, #tpu.memory_space<vmem>>, vector<8x128xf32>
    %cst_86 = arith.constant dense<0.000000e+00> : vector<8x128xf32>
    %280 = tpu.matmul %247, %10, %cst_86 {dimension_numbers = #tpu.dot_dimension_numbers<[1], [0], [0], [1], [0, 0, 1, 1], [], []>} : vector<8x32xf32>, vector<32x128xf32>, vector<8x128xf32> -> vector<8x128xf32>
    %281 = arith.addf %279, %280 : vector<8x128xf32>
    %cst_87 = arith.constant 5.000000e-01 : f32
    %282 = vector.broadcast %cst_87 : f32 to vector<8x128xf32>
    %283 = arith.mulf %282, %281 : vector<8x128xf32>
    %284 = math.tanh %283 : vector<8x128xf32>
    %cst_88 = arith.constant 5.000000e-01 : f32
    %285 = vector.broadcast %cst_88 : f32 to vector<8x128xf32>
    %286 = arith.mulf %285, %284 : vector<8x128xf32>
    %cst_89 = arith.constant 5.000000e-01 : f32
    %287 = vector.broadcast %cst_89 : f32 to vector<8x128xf32>
    %288 = arith.addf %286, %287 : vector<8x128xf32>
    %289 = math.tanh %281 : vector<8x128xf32>
    %290 = vector.extract_strided_slice %288 {offsets = [0, 0], sizes = [8, 32], strides = [1, 1]} : vector<8x128xf32> to vector<8x32xf32>
    %291 = vector.extract_strided_slice %288 {offsets = [0, 32], sizes = [8, 32], strides = [1, 1]} : vector<8x128xf32> to vector<8x32xf32>
    %292 = vector.extract_strided_slice %289 {offsets = [0, 64], sizes = [8, 32], strides = [1, 1]} : vector<8x128xf32> to vector<8x32xf32>
    %293 = vector.extract_strided_slice %288 {offsets = [0, 96], sizes = [8, 32], strides = [1, 1]} : vector<8x128xf32> to vector<8x32xf32>
    %294 = arith.mulf %291, %245 : vector<8x32xf32>
    %295 = arith.mulf %290, %292 : vector<8x32xf32>
    %296 = arith.addf %294, %295 : vector<8x32xf32>
    %297 = math.tanh %296 : vector<8x32xf32>
    %298 = arith.mulf %293, %297 : vector<8x32xf32>
    %cst_90 = arith.constant dense<0.000000e+00> : vector<8x128xf32>
    %299 = tpu.matmul %298, %11, %cst_90 {dimension_numbers = #tpu.dot_dimension_numbers<[1], [0], [0], [1], [0, 0, 1, 1], [], []>} : vector<8x32xf32>, vector<32x128xf32>, vector<8x128xf32> -> vector<8x128xf32>
    %cst_91 = arith.constant dense<0.000000e+00> : vector<8x128xf32>
    %300 = tpu.matmul %269, %12, %cst_91 {dimension_numbers = #tpu.dot_dimension_numbers<[1], [0], [0], [1], [0, 0, 1, 1], [], []>} : vector<8x32xf32>, vector<32x128xf32>, vector<8x128xf32> -> vector<8x128xf32>
    %301 = arith.addf %299, %300 : vector<8x128xf32>
    %302 = vector.broadcast %13 : vector<1x128xf32> to vector<8x128xf32>
    %303 = arith.addf %301, %302 : vector<8x128xf32>
    %cst_92 = arith.constant 5.000000e-01 : f32
    %304 = vector.broadcast %cst_92 : f32 to vector<8x128xf32>
    %305 = arith.mulf %304, %303 : vector<8x128xf32>
    %306 = math.tanh %305 : vector<8x128xf32>
    %cst_93 = arith.constant 5.000000e-01 : f32
    %307 = vector.broadcast %cst_93 : f32 to vector<8x128xf32>
    %308 = arith.mulf %307, %306 : vector<8x128xf32>
    %cst_94 = arith.constant 5.000000e-01 : f32
    %309 = vector.broadcast %cst_94 : f32 to vector<8x128xf32>
    %310 = arith.addf %308, %309 : vector<8x128xf32>
    %311 = math.tanh %303 : vector<8x128xf32>
    %312 = vector.extract_strided_slice %310 {offsets = [0, 0], sizes = [8, 32], strides = [1, 1]} : vector<8x128xf32> to vector<8x32xf32>
    %313 = vector.extract_strided_slice %310 {offsets = [0, 32], sizes = [8, 32], strides = [1, 1]} : vector<8x128xf32> to vector<8x32xf32>
    %314 = vector.extract_strided_slice %311 {offsets = [0, 64], sizes = [8, 32], strides = [1, 1]} : vector<8x128xf32> to vector<8x32xf32>
    %315 = vector.extract_strided_slice %310 {offsets = [0, 96], sizes = [8, 32], strides = [1, 1]} : vector<8x128xf32> to vector<8x32xf32>
    %316 = arith.mulf %313, %267 : vector<8x32xf32>
    %317 = arith.mulf %312, %314 : vector<8x32xf32>
    %318 = arith.addf %316, %317 : vector<8x32xf32>
    %319 = math.tanh %318 : vector<8x32xf32>
    %320 = arith.mulf %315, %319 : vector<8x32xf32>
    %321 = arith.addi %15, %c5_i32 : i32
    %322 = vector.broadcast %321 : i32 to vector<8x1xi32>
    %323 = arith.cmpi eq, %14, %322 : vector<8x1xi32>
    %324 = vector.shape_cast %323 : vector<8x1xi1> to vector<8x1xi1>
    %325 = vector.broadcast %324 : vector<8x1xi1> to vector<8x32xi1>
    %326 = arith.select %325, %320, %275 : vector<8x32xi1>, vector<8x32xf32>
    %c6_i32 = arith.constant 6 : i32
    %c8_i32_95 = arith.constant 8 : i32
    %327 = arith.muli %c6_i32, %c8_i32_95 : i32
    %328 = tpu.assume_multiple %327, 8 : i32
    %329 = arith.index_cast %328 : i32 to index
    %c0_96 = arith.constant 0 : index
    %330 = vector.load %arg12[%329, %c0_96] : memref<64x128xf32, #tpu.memory_space<vmem>>, vector<8x128xf32>
    %cst_97 = arith.constant dense<0.000000e+00> : vector<8x128xf32>
    %331 = tpu.matmul %298, %10, %cst_97 {dimension_numbers = #tpu.dot_dimension_numbers<[1], [0], [0], [1], [0, 0, 1, 1], [], []>} : vector<8x32xf32>, vector<32x128xf32>, vector<8x128xf32> -> vector<8x128xf32>
    %332 = arith.addf %330, %331 : vector<8x128xf32>
    %cst_98 = arith.constant 5.000000e-01 : f32
    %333 = vector.broadcast %cst_98 : f32 to vector<8x128xf32>
    %334 = arith.mulf %333, %332 : vector<8x128xf32>
    %335 = math.tanh %334 : vector<8x128xf32>
    %cst_99 = arith.constant 5.000000e-01 : f32
    %336 = vector.broadcast %cst_99 : f32 to vector<8x128xf32>
    %337 = arith.mulf %336, %335 : vector<8x128xf32>
    %cst_100 = arith.constant 5.000000e-01 : f32
    %338 = vector.broadcast %cst_100 : f32 to vector<8x128xf32>
    %339 = arith.addf %337, %338 : vector<8x128xf32>
    %340 = math.tanh %332 : vector<8x128xf32>
    %341 = vector.extract_strided_slice %339 {offsets = [0, 0], sizes = [8, 32], strides = [1, 1]} : vector<8x128xf32> to vector<8x32xf32>
    %342 = vector.extract_strided_slice %339 {offsets = [0, 32], sizes = [8, 32], strides = [1, 1]} : vector<8x128xf32> to vector<8x32xf32>
    %343 = vector.extract_strided_slice %340 {offsets = [0, 64], sizes = [8, 32], strides = [1, 1]} : vector<8x128xf32> to vector<8x32xf32>
    %344 = vector.extract_strided_slice %339 {offsets = [0, 96], sizes = [8, 32], strides = [1, 1]} : vector<8x128xf32> to vector<8x32xf32>
    %345 = arith.mulf %342, %296 : vector<8x32xf32>
    %346 = arith.mulf %341, %343 : vector<8x32xf32>
    %347 = arith.addf %345, %346 : vector<8x32xf32>
    %348 = math.tanh %347 : vector<8x32xf32>
    %349 = arith.mulf %344, %348 : vector<8x32xf32>
    %cst_101 = arith.constant dense<0.000000e+00> : vector<8x128xf32>
    %350 = tpu.matmul %349, %11, %cst_101 {dimension_numbers = #tpu.dot_dimension_numbers<[1], [0], [0], [1], [0, 0, 1, 1], [], []>} : vector<8x32xf32>, vector<32x128xf32>, vector<8x128xf32> -> vector<8x128xf32>
    %cst_102 = arith.constant dense<0.000000e+00> : vector<8x128xf32>
    %351 = tpu.matmul %320, %12, %cst_102 {dimension_numbers = #tpu.dot_dimension_numbers<[1], [0], [0], [1], [0, 0, 1, 1], [], []>} : vector<8x32xf32>, vector<32x128xf32>, vector<8x128xf32> -> vector<8x128xf32>
    %352 = arith.addf %350, %351 : vector<8x128xf32>
    %353 = vector.broadcast %13 : vector<1x128xf32> to vector<8x128xf32>
    %354 = arith.addf %352, %353 : vector<8x128xf32>
    %cst_103 = arith.constant 5.000000e-01 : f32
    %355 = vector.broadcast %cst_103 : f32 to vector<8x128xf32>
    %356 = arith.mulf %355, %354 : vector<8x128xf32>
    %357 = math.tanh %356 : vector<8x128xf32>
    %cst_104 = arith.constant 5.000000e-01 : f32
    %358 = vector.broadcast %cst_104 : f32 to vector<8x128xf32>
    %359 = arith.mulf %358, %357 : vector<8x128xf32>
    %cst_105 = arith.constant 5.000000e-01 : f32
    %360 = vector.broadcast %cst_105 : f32 to vector<8x128xf32>
    %361 = arith.addf %359, %360 : vector<8x128xf32>
    %362 = math.tanh %354 : vector<8x128xf32>
    %363 = vector.extract_strided_slice %361 {offsets = [0, 0], sizes = [8, 32], strides = [1, 1]} : vector<8x128xf32> to vector<8x32xf32>
    %364 = vector.extract_strided_slice %361 {offsets = [0, 32], sizes = [8, 32], strides = [1, 1]} : vector<8x128xf32> to vector<8x32xf32>
    %365 = vector.extract_strided_slice %362 {offsets = [0, 64], sizes = [8, 32], strides = [1, 1]} : vector<8x128xf32> to vector<8x32xf32>
    %366 = vector.extract_strided_slice %361 {offsets = [0, 96], sizes = [8, 32], strides = [1, 1]} : vector<8x128xf32> to vector<8x32xf32>
    %367 = arith.mulf %364, %318 : vector<8x32xf32>
    %368 = arith.mulf %363, %365 : vector<8x32xf32>
    %369 = arith.addf %367, %368 : vector<8x32xf32>
    %370 = math.tanh %369 : vector<8x32xf32>
    %371 = arith.mulf %366, %370 : vector<8x32xf32>
    %372 = arith.addi %15, %c6_i32 : i32
    %373 = vector.broadcast %372 : i32 to vector<8x1xi32>
    %374 = arith.cmpi eq, %14, %373 : vector<8x1xi32>
    %375 = vector.shape_cast %374 : vector<8x1xi1> to vector<8x1xi1>
    %376 = vector.broadcast %375 : vector<8x1xi1> to vector<8x32xi1>
    %377 = arith.select %376, %371, %326 : vector<8x32xi1>, vector<8x32xf32>
    %c7_i32 = arith.constant 7 : i32
    %c8_i32_106 = arith.constant 8 : i32
    %378 = arith.muli %c7_i32, %c8_i32_106 : i32
    %379 = tpu.assume_multiple %378, 8 : i32
    %380 = arith.index_cast %379 : i32 to index
    %c0_107 = arith.constant 0 : index
    %381 = vector.load %arg12[%380, %c0_107] : memref<64x128xf32, #tpu.memory_space<vmem>>, vector<8x128xf32>
    %cst_108 = arith.constant dense<0.000000e+00> : vector<8x128xf32>
    %382 = tpu.matmul %349, %10, %cst_108 {dimension_numbers = #tpu.dot_dimension_numbers<[1], [0], [0], [1], [0, 0, 1, 1], [], []>} : vector<8x32xf32>, vector<32x128xf32>, vector<8x128xf32> -> vector<8x128xf32>
    %383 = arith.addf %381, %382 : vector<8x128xf32>
    %cst_109 = arith.constant 5.000000e-01 : f32
    %384 = vector.broadcast %cst_109 : f32 to vector<8x128xf32>
    %385 = arith.mulf %384, %383 : vector<8x128xf32>
    %386 = math.tanh %385 : vector<8x128xf32>
    %cst_110 = arith.constant 5.000000e-01 : f32
    %387 = vector.broadcast %cst_110 : f32 to vector<8x128xf32>
    %388 = arith.mulf %387, %386 : vector<8x128xf32>
    %cst_111 = arith.constant 5.000000e-01 : f32
    %389 = vector.broadcast %cst_111 : f32 to vector<8x128xf32>
    %390 = arith.addf %388, %389 : vector<8x128xf32>
    %391 = math.tanh %383 : vector<8x128xf32>
    %392 = vector.extract_strided_slice %390 {offsets = [0, 0], sizes = [8, 32], strides = [1, 1]} : vector<8x128xf32> to vector<8x32xf32>
    %393 = vector.extract_strided_slice %390 {offsets = [0, 32], sizes = [8, 32], strides = [1, 1]} : vector<8x128xf32> to vector<8x32xf32>
    %394 = vector.extract_strided_slice %391 {offsets = [0, 64], sizes = [8, 32], strides = [1, 1]} : vector<8x128xf32> to vector<8x32xf32>
    %395 = vector.extract_strided_slice %390 {offsets = [0, 96], sizes = [8, 32], strides = [1, 1]} : vector<8x128xf32> to vector<8x32xf32>
    %396 = arith.mulf %393, %347 : vector<8x32xf32>
    %397 = arith.mulf %392, %394 : vector<8x32xf32>
    %398 = arith.addf %396, %397 : vector<8x32xf32>
    %399 = math.tanh %398 : vector<8x32xf32>
    %400 = arith.mulf %395, %399 : vector<8x32xf32>
    %cst_112 = arith.constant dense<0.000000e+00> : vector<8x128xf32>
    %401 = tpu.matmul %400, %11, %cst_112 {dimension_numbers = #tpu.dot_dimension_numbers<[1], [0], [0], [1], [0, 0, 1, 1], [], []>} : vector<8x32xf32>, vector<32x128xf32>, vector<8x128xf32> -> vector<8x128xf32>
    %cst_113 = arith.constant dense<0.000000e+00> : vector<8x128xf32>
    %402 = tpu.matmul %371, %12, %cst_113 {dimension_numbers = #tpu.dot_dimension_numbers<[1], [0], [0], [1], [0, 0, 1, 1], [], []>} : vector<8x32xf32>, vector<32x128xf32>, vector<8x128xf32> -> vector<8x128xf32>
    %403 = arith.addf %401, %402 : vector<8x128xf32>
    %404 = vector.broadcast %13 : vector<1x128xf32> to vector<8x128xf32>
    %405 = arith.addf %403, %404 : vector<8x128xf32>
    %cst_114 = arith.constant 5.000000e-01 : f32
    %406 = vector.broadcast %cst_114 : f32 to vector<8x128xf32>
    %407 = arith.mulf %406, %405 : vector<8x128xf32>
    %408 = math.tanh %407 : vector<8x128xf32>
    %cst_115 = arith.constant 5.000000e-01 : f32
    %409 = vector.broadcast %cst_115 : f32 to vector<8x128xf32>
    %410 = arith.mulf %409, %408 : vector<8x128xf32>
    %cst_116 = arith.constant 5.000000e-01 : f32
    %411 = vector.broadcast %cst_116 : f32 to vector<8x128xf32>
    %412 = arith.addf %410, %411 : vector<8x128xf32>
    %413 = math.tanh %405 : vector<8x128xf32>
    %414 = vector.extract_strided_slice %412 {offsets = [0, 0], sizes = [8, 32], strides = [1, 1]} : vector<8x128xf32> to vector<8x32xf32>
    %415 = vector.extract_strided_slice %412 {offsets = [0, 32], sizes = [8, 32], strides = [1, 1]} : vector<8x128xf32> to vector<8x32xf32>
    %416 = vector.extract_strided_slice %413 {offsets = [0, 64], sizes = [8, 32], strides = [1, 1]} : vector<8x128xf32> to vector<8x32xf32>
    %417 = vector.extract_strided_slice %412 {offsets = [0, 96], sizes = [8, 32], strides = [1, 1]} : vector<8x128xf32> to vector<8x32xf32>
    %418 = arith.mulf %415, %369 : vector<8x32xf32>
    %419 = arith.mulf %414, %416 : vector<8x32xf32>
    %420 = arith.addf %418, %419 : vector<8x32xf32>
    %421 = math.tanh %420 : vector<8x32xf32>
    %422 = arith.mulf %417, %421 : vector<8x32xf32>
    %423 = arith.addi %15, %c7_i32 : i32
    %424 = vector.broadcast %423 : i32 to vector<8x1xi32>
    %425 = arith.cmpi eq, %14, %424 : vector<8x1xi32>
    %426 = vector.shape_cast %425 : vector<8x1xi1> to vector<8x1xi1>
    %427 = vector.broadcast %426 : vector<8x1xi1> to vector<8x32xi1>
    %428 = arith.select %427, %422, %377 : vector<8x32xi1>, vector<8x32xf32>
    %c8_i32_117 = arith.constant 8 : i32
    %c0_118 = arith.constant 0 : index
    %c0_119 = arith.constant 0 : index
    %429 = vector.load %arg13[%c0_118, %c0_119] : memref<8x32xf32, #tpu.memory_space<vmem>>, vector<8x32xf32>
    tpu.vector_store %arg13[%c0_118, %c0_119], %400 {strides = array<i32>} : memref<8x32xf32, #tpu.memory_space<vmem>>, vector<8x32xf32>,
    %c0_120 = arith.constant 0 : index
    %c0_121 = arith.constant 0 : index
    %430 = vector.load %arg14[%c0_120, %c0_121] : memref<8x32xf32, #tpu.memory_space<vmem>>, vector<8x32xf32>
    tpu.vector_store %arg14[%c0_120, %c0_121], %398 {strides = array<i32>} : memref<8x32xf32, #tpu.memory_space<vmem>>, vector<8x32xf32>,
    %c0_122 = arith.constant 0 : index
    %c0_123 = arith.constant 0 : index
    %431 = vector.load %arg15[%c0_122, %c0_123] : memref<8x32xf32, #tpu.memory_space<vmem>>, vector<8x32xf32>
    tpu.vector_store %arg15[%c0_122, %c0_123], %422 {strides = array<i32>} : memref<8x32xf32, #tpu.memory_space<vmem>>, vector<8x32xf32>,
    %c0_124 = arith.constant 0 : index
    %c0_125 = arith.constant 0 : index
    %432 = vector.load %arg16[%c0_124, %c0_125] : memref<8x32xf32, #tpu.memory_space<vmem>>, vector<8x32xf32>
    tpu.vector_store %arg16[%c0_124, %c0_125], %420 {strides = array<i32>} : memref<8x32xf32, #tpu.memory_space<vmem>>, vector<8x32xf32>,
    %c0_126 = arith.constant 0 : index
    %c0_127 = arith.constant 0 : index
    %433 = vector.load %arg17[%c0_126, %c0_127] : memref<8x32xf32, #tpu.memory_space<vmem>>, vector<8x32xf32>
    tpu.vector_store %arg17[%c0_126, %c0_127], %428 {strides = array<i32>} : memref<8x32xf32, #tpu.memory_space<vmem>>, vector<8x32xf32>,
    %c0_i32_128 = arith.constant 0 : i32
    %434 = arith.cmpi eq, %arg0, %c0_i32_128 : i32
    %435 = arith.extui %434 : i1 to i32
    %c0_i32_129 = arith.constant 0 : i32
    %436 = arith.cmpi ne, %435, %c0_i32_129 : i32
    scf.if %436 {
      %c0_130 = arith.constant 0 : index
      %c0_131 = arith.constant 0 : index
      %437 = vector.load %arg9[%c0_130, %c0_131] : memref<64x1xf32, #tpu.memory_space<vmem>>, vector<64x1xf32>
      %438 = vector.extract_strided_slice %428 {offsets = [0, 0], sizes = [2, 32], strides = [1, 1]} : vector<8x32xf32> to vector<2x32xf32>
      %439 = vector.extract_strided_slice %437 {offsets = [0, 0], sizes = [32, 1], strides = [1, 1]} : vector<64x1xf32> to vector<32x1xf32>
      %cst_132 = arith.constant dense<0.000000e+00> : vector<2x1xf32>
      %440 = tpu.matmul %438, %439, %cst_132 {dimension_numbers = #tpu.dot_dimension_numbers<[1], [0], [0], [1], [0, 0, 1, 1], [], []>} : vector<2x32xf32>, vector<32x1xf32>, vector<2x1xf32> -> vector<2x1xf32>
      %441 = vector.extract_strided_slice %428 {offsets = [2, 0], sizes = [2, 32], strides = [1, 1]} : vector<8x32xf32> to vector<2x32xf32>
      %442 = vector.extract_strided_slice %437 {offsets = [32, 0], sizes = [32, 1], strides = [1, 1]} : vector<64x1xf32> to vector<32x1xf32>
      %cst_133 = arith.constant dense<0.000000e+00> : vector<2x1xf32>
      %443 = tpu.matmul %441, %442, %cst_133 {dimension_numbers = #tpu.dot_dimension_numbers<[1], [0], [0], [1], [0, 0, 1, 1], [], []>} : vector<2x32xf32>, vector<32x1xf32>, vector<2x1xf32> -> vector<2x1xf32>
      %444 = arith.addf %440, %443 : vector<2x1xf32>
      %c0_134 = arith.constant 0 : index
      %c0_135 = arith.constant 0 : index
      %445 = vector.load %arg10[%c0_134, %c0_135] : memref<1x1xf32, #tpu.memory_space<vmem>>, vector<1x1xf32>
      %446 = vector.broadcast %445 : vector<1x1xf32> to vector<2x1xf32>
      %447 = arith.addf %444, %446 : vector<2x1xf32>
      %c0_136 = arith.constant 0 : index
      %c0_137 = arith.constant 0 : index
      %448 = vector.load %arg11[%c0_136, %c0_137] : memref<2x1xf32, #tpu.memory_space<vmem>>, vector<2x1xf32>
      tpu.vector_store %arg11[%c0_136, %c0_137], %447 {strides = array<i32>} : memref<2x1xf32, #tpu.memory_space<vmem>>, vector<2x1xf32>,
    } else {
    }
    return
  }
  func.func @transform_0(%arg0: i32) -> (i32, i32) {
    %c0_i32 = arith.constant 0 : i32
    %c0_i32_0 = arith.constant 0 : i32
    return %arg0, %c0_i32 : i32, i32
  }
  func.func @transform_1(%arg0: i32) -> (i32, i32) {
    %c0_i32 = arith.constant 0 : i32
    %c0_i32_0 = arith.constant 0 : i32
    %c0_i32_1 = arith.constant 0 : i32
    return %c0_i32, %c0_i32_0 : i32, i32
  }
  func.func @transform_2(%arg0: i32) -> (i32, i32) {
    %c0_i32 = arith.constant 0 : i32
    %c0_i32_0 = arith.constant 0 : i32
    %c0_i32_1 = arith.constant 0 : i32
    return %c0_i32, %c0_i32_0 : i32, i32
  }
  func.func @transform_3(%arg0: i32) -> (i32, i32) {
    %c0_i32 = arith.constant 0 : i32
    %c0_i32_0 = arith.constant 0 : i32
    %c0_i32_1 = arith.constant 0 : i32
    return %c0_i32, %c0_i32_0 : i32, i32
  }
  func.func @transform_4(%arg0: i32) -> (i32, i32) {
    %c0_i32 = arith.constant 0 : i32
    %c0_i32_0 = arith.constant 0 : i32
    %c0_i32_1 = arith.constant 0 : i32
    return %c0_i32, %c0_i32_0 : i32, i32
  }
  func.func @transform_5(%arg0: i32) -> (i32, i32) {
    %c0_i32 = arith.constant 0 : i32
    %c0_i32_0 = arith.constant 0 : i32
    %c0_i32_1 = arith.constant 0 : i32
    return %c0_i32, %c0_i32_0 : i32, i32
  }
  func.func @transform_6(%arg0: i32) -> (i32, i32) {
    %c0_i32 = arith.constant 0 : i32
    %c0_i32_0 = arith.constant 0 : i32
    %c0_i32_1 = arith.constant 0 : i32
    return %c0_i32, %c0_i32_0 : i32, i32
  }
  func.func @transform_7(%arg0: i32) -> (i32, i32) {
    %c0_i32 = arith.constant 0 : i32
    %c0_i32_0 = arith.constant 0 : i32
    %c0_i32_1 = arith.constant 0 : i32
    return %c0_i32, %c0_i32_0 : i32, i32
  }
  func.func @transform_8(%arg0: i32) -> (i32, i32) {
    %c0_i32 = arith.constant 0 : i32
    %c0_i32_0 = arith.constant 0 : i32
    %c0_i32_1 = arith.constant 0 : i32
    return %c0_i32, %c0_i32_0 : i32, i32
  }
  func.func @transform_9(%arg0: i32) -> (i32, i32) {
    %c0_i32 = arith.constant 0 : i32
    %c0_i32_0 = arith.constant 0 : i32
    %c0_i32_1 = arith.constant 0 : i32
    return %c0_i32, %c0_i32_0 : i32, i32
  }
  func.func @transform_10(%arg0: i32) -> (i32, i32) {
    %c0_i32 = arith.constant 0 : i32
    %c0_i32_0 = arith.constant 0 : i32
    %c0_i32_1 = arith.constant 0 : i32
    return %c0_i32, %c0_i32_0 : i32, i32
  }
}

</mosaic_0001>

<bundles_post_ra>
// kernel: tpu_custom_call.1
= control target key start
LH: loop header
LB: loop body
LE: loop exit
PB: predicated region body
PF: predicated region fallthrough
CT: control target
= control target key end

     0   :  { %vm41_vm0 = vcmask 261120   ;;  %v3247_v0 = vmov 0.0   ;;  %vm3248_vm1 = vmmov 0   ;;  %vm64_vm2 = vcmask 130048   ;;  %s3249_s30 = smov 64   ;;  %s3250_s11 = smov 32   ;;  %s3986_s1 = inlined_call_operand.vmem [shape: f32[16,128], index: 1, kind: input, shape index: {}]   ;;  %s3987_s3 = inlined_call_operand.vmem [shape: f32[32,128], index: 3, kind: input, shape index: {}]   ;;  %s3988_s0 = inlined_call_operand.vmem [shape: f32[64,16], index: 0, kind: input, shape index: {}]   ;;  %s3989_s2 = inlined_call_operand.vmem [shape: f32[1,128], index: 2, kind: input, shape index: {}]   ;;  %s3990_s4 = inlined_call_operand.vmem [shape: f32[32,128], index: 4, kind: input, shape index: {}]   ;;  %s3991_s5 = inlined_call_operand.vmem [shape: f32[32,128], index: 5, kind: input, shape index: {}]   ;;  %s3992_s6 = inlined_call_operand.vmem [shape: f32[1,128], index: 6, kind: input, shape index: {}]   ;;  %s3993_s7 = inlined_call_operand.vmem [shape: s32[8,1], index: 7, kind: input, shape index: {}]   ;;  %s3994_s8 = inlined_call_operand.vmem [shape: f32[64,1], index: 8, kind: input, shape index: {}]   ;;  %s3995_s9 = inlined_call_operand.<no memory space> [shape: f32[1,1], index: 9, kind: input, shape index: {}]   ;;  %s3996_s10 = inlined_call_operand.vmem [shape: f32[2,1], index: 10, kind: output, shape index: {}]  }
   0x1   :  { %2843 = vmatprep.subr.mxu1 %v3247_v0  ;;  %v56_v1 = vld [vmem:[%s3986_s1 + $0x8] sm:$0xff]  ;;  %v3315_v2 = vld [vmem:[%s3987_s3 + $0x18] sm:$0xff]  ;;  %v55_v3 = vld [vmem:[%s3986_s1] sm:$0xff]  ;;  %2851 = vmatprep.mubr.msk.f32.mxu1 %vm3248_vm1, %v3247_v0  ;;  %42 = vst.msk [vmem:[#allocation3] sm:$0xff] %vm41_vm0, %v3247_v0 }
   0x2   :  { %43 = vst.msk [vmem:[#allocation4] sm:$0xff] %vm41_vm0, %v3247_v0  ;;  %44 = vst.msk [vmem:[#allocation5] sm:$0xff] %vm41_vm0, %v3247_v0  ;;  %2827 = vmatprep.subr.mxu0 %v56_v1  ;;  %2844 = vmatpush3.msra.mxu1 %v3315_v2  ;;  %v3336_v4 = vld [vmem:[%s3987_s3 + $0x10] sm:$0xff]  ;;  %v47_v5 = vld [vmem:[%s3988_s0] sm:$0xff] }
   0x3   :  { %45 = vst.msk [vmem:[#allocation6] sm:$0xff] %vm41_vm0, %v3247_v0  ;;  %46 = vst.msk [vmem:[#allocation7] sm:$0xff] %vm41_vm0, %v3247_v0  ;;  %2828 = vmatpush3.msra.mxu0 %v56_v1  ;;  %2845 = vmatprep.subr.mxu1 %v3247_v0  ;;  %v48_v6 = vld [vmem:[%s3988_s0 + $0x8] sm:$0xff]  ;;  %v3357_v8 = vld [vmem:[%s3987_s3] sm:$0xff] }
   0x4   :  { %2829 = vmatprep.subr.mxu0 %v55_v3  ;;  %2846 = vmatpush3.msra.mxu1 %v3336_v4  ;;  %v3349_v7 = vld [vmem:[%s3987_s3 + $0x8] sm:$0xff]  ;;  %v3372_v11 = vld [vmem:[%s3989_s2] ss:$0 sm:$0xff]  ;;  %v49_v29 = vld [vmem:[%s3988_s0 + $0x10] sm:$0xff] }
   0x5   :  { %2830 = vmatpush3.msra.mxu0 %v55_v3  ;;  %2831 = vmatprep.mubr.msk.f32.mxu0 %vm64_vm2, %v47_v5  ;;  %v50_v30 = vld [vmem:[%s3988_s0 + $0x18] sm:$0xff]  ;;  %v3401_v33 = vld [vmem:[%s3991_s5 + $0x10] sm:$0xff]  ;;  %v51_v35 = vld [vmem:[%s3988_s0 + $0x20] sm:$0xff] }
   0x6   :  { %2847 = vmatprep.subr.mxu1 %v3247_v0  ;;  %2832 = vmatmul.mubr.msk.f32.vlgmr.msra.gmra.mxu0 %vm64_vm2, %v48_v6  ;;  %v3390_v31 = vld [vmem:[%s3990_s4 + $0x18] sm:$0xff]  ;;  %v3408_v34 = vld [vmem:[%s3990_s4 + $0x10] sm:$0xff]  ;;  %v3418_v36 = vld [vmem:[%s3991_s5 + $0x8] sm:$0xff] }
   0x7   :  { %2848 = vmatpush3.msra.mxu1 %v3349_v7  ;;  %2865 = vmatprep.subr.mxu0 %v3247_v0  ;;  %v3396_v32 = vld [vmem:[%s3991_s5 + $0x18] sm:$0xff]  ;;  %v52_v37 = vld [vmem:[%s3988_s0 + $0x28] sm:$0xff]  ;;  %v3430_v38 = vld [vmem:[%s3991_s5] sm:$0xff] }
   0x8   :  { %2849 = vmatprep.subr.mxu1 %v3247_v0  ;;  %v217_v9 = vld [vmem:[#allocation3] sm:$0xff]  ;;  %2834 = vmatprep.mubr.msk.f32.mxu0 %vm64_vm2, %v49_v29  ;;  %v3437_v39 = vld [vmem:[%s3990_s4 + $0x8] sm:$0xff]  ;;  %v53_v40 = vld [vmem:[%s3988_s0 + $0x30] sm:$0xff] }
   0x9   :  { %2850 = vmatpush3.msra.mxu1 %v3357_v8  ;;  %v218_v18 = vld [vmem:[#allocation4] sm:$0xff]  ;;  %2866 = vmatpush3.msra.mxu0 %v3390_v31  ;;  %v219_v41 = vld [vmem:[#allocation5] sm:$0xff]  ;;  %v54_v42 = vld [vmem:[%s3988_s0 + $0x38] sm:$0xff] }
   0xa   :  { %2852 = vmatmul.mubr.msk.f32.vlgmr.msra.gmra.mxu1 %vm41_vm0, %v217_v9  ;;  %2854 = vmatprep.subr.mxu1 %v3247_v0  ;;  %v3458_v44 = vld [vmem:[%s3990_s4] sm:$0xff]  ;;  %v220_v6 = vld [vmem:[#allocation6] sm:$0xff] }
   0xb   :  { %2862 = vmatprep.mubr.msk.f32.mxu1 %vm3248_vm1, %v3247_v0  ;;  %2855 = vmatpush3.msra.mxu1 %v3396_v32  ;;  %v3515_v57 = vld [vmem:[%s3992_s6] ss:$0 sm:$0xff] }
   0xc   :  { %2835 = vmatmul.mubr.msk.f32.gmra.mxu0 %vm64_vm2, %v50_v30  ;;  %2856 = vmatprep.subr.mxu1 %v3247_v0 }
   0xd   :  { %2857 = vmatpush3.msra.mxu1 %v3401_v33  ;;  %2867 = vmatprep.subr.mxu0 %v3247_v0 }
   0xe   :  { %2858 = vmatprep.subr.mxu1 %v3247_v0  ;;  %2868 = vmatpush3.msra.mxu0 %v3408_v34 }
   0xf   :  { %2837 = vmatprep.mubr.msk.f32.mxu0 %vm64_vm2, %v51_v35  ;;  %2859 = vmatpush3.msra.mxu1 %v3418_v36 }
  0x10   :  { %2838 = vmatmul.mubr.msk.f32.gmra.mxu0 %vm64_vm2, %v52_v37  ;;  %2860 = vmatprep.subr.mxu1 %v3247_v0 }
  0x11   :  { %2861 = vmatpush3.msra.mxu1 %v3430_v38  ;;  %2869 = vmatprep.subr.mxu0 %v3247_v0 }
  0x12   :  { %2870 = vmatpush3.msra.mxu0 %v3437_v39  ;;  %2876 = vmatprep.subr.mxu1 %v3247_v0 }
  0x13   :  { %2840 = vmatprep.mubr.msk.f32.mxu0 %vm64_vm2, %v53_v40  ;;  %2863 = vmatmul.mubr.msk.f32.vlgmr.msra.gmra.mxu1 %vm41_vm0, %v219_v41 }
  0x14   :  { %2877 = vmatpush3.msra.mxu1 %v3315_v2  ;;  %2841 = vmatmul.mubr.msk.f32.gmra.mxu0 %vm64_vm2, %v54_v42 }
  0x15   :  { %2878 = vmatprep.subr.mxu1 %v3247_v0  ;;  %2871 = vmatprep.subr.mxu0 %v3247_v0 }
  0x16   :  { %2879 = vmatpush3.msra.mxu1 %v3336_v4  ;;  %2872 = vmatpush3.msra.mxu0 %v3458_v44 }
  0x17   :  { %2880 = vmatprep.subr.mxu1 %v3247_v0  ;;  %2873 = vmatprep.mubr.msk.f32.mxu0 %vm3248_vm1, %v3247_v0 }
  0x18   :  { %2881 = vmatpush3.msra.mxu1 %v3349_v7  ;;  %2884 = vmatprep.mubr.msk.f32.mxu1 %vm3248_vm1, %v3247_v0 }
  0x19   :  { %2882 = vmatprep.subr.mxu1 %v3247_v0  ;;  %2887 = vmatprep.subr.mxu0 %v3247_v0 }
  0x1a   :  { %2883 = vmatpush3.msra.mxu1 %v3357_v8 }
  0x1b   :  { %2898 = vmatprep.subr.mxu1 %v3247_v0 }
  0xc6   :  { %v3367_v10 = vpop.f32.mrf.mxu0 }
  0xc7   :  { %v161_v56 = vadd.f32 %v3367_v10, %v3372_v11 }
  0xc8   :  { %v155_v12 = vpop.f32.mrf.mxu0 }
  0xc9   :  { %v156_v13 = vadd.f32 %v3372_v11, %v155_v12 }
  0xca   :  { %v293_v14 = vpop.f32.mrf.mxu1 }
  0xcb   :  { %v297_v15 = vadd.f32 %v293_v14, %v156_v13 }
  0xcc   :  { %v2853_v16 = vpop.f32.mrf.mxu1  ;;  %v3498_v50 = vpop.f32.mrf.mxu0 }
  0xcd   :  { %3137 = vtanh.f32 %v297_v15  ;;  %v298_v19 = vmul.f32 0.5, %v297_v15 }
  0xce   :  { %v3500_v51 = vpop.f32.mrf.mxu0 }
  0xcf   :  { %3139 = vtanh.f32 %v298_v19 }
  0xd0   :  { %v3502_v52 = vpop.f32.mrf.mxu0 }
  0xd2   :  { %v3504_v53 = vpop.f32.mrf.mxu0 }
  0xd3   :  { %v393_v47 = vpop.f32.mrf.mxu1 }
  0xd4   :  { %v3506_v54 = vpop.f32.mrf.mxu0 }
  0xd5   :  { %v2864_v48 = vpop.f32.mrf.mxu1 }
  0xd6   :  { %v3508_v55 = vpop.f32.mrf.mxu0 }
  0xda   :  { %v3138_v17 = vpop.eup %3137 }
  0xdb   :  { %309 = vrot.lane.b32.xlu0 %v3138_v17, %s3249_s30 }
  0xdc   :  { %v3140_v20 = vpop.eup %3139 }
  0xdd   :  { %v300_v21 = vmul.f32 0.5, %v3140_v20 }
  0xdf   :  { %304 = vrot.lane.b32.xlu0 %v218_v18, %s3250_s11  ;;  %v301_v22 = vadd.f32 0.5, %v300_v21 }
 0x14d   :  { %v310_v23 = vpop.permute.xlu0 %309 }
 0x14e   :  { %v312_v24 = vmul.f32 %v310_v23, %v301_v22 }
 0x150   :  { %314 = vrot.lane.b32.xlu1 %v312_v24, %s3250_s11 }
 0x151   :  { %v305_v25 = vpop.permute.xlu0 %304 }
 0x152   :  { %v307_v26 = vmul.f32 %v305_v25, %v301_v22 }
 0x1c2   :  { %v315_v27 = vpop.permute.xlu1 %314 }
 0x1c3   :  { %v3378_v28 = vadd.f32 %v315_v27, %v307_v26 }
 0x1c5   :  { %3141 = vtanh.f32 %v3378_v28 }
 0x1d2   :  { %v3142_v43 = vpop.eup %3141 }
 0x1d3   :  { %320 = vrot.lane.b32.xlu1 %v3142_v43, %s3249_s30 }
 0x245   :  { %v321_v45 = vpop.permute.xlu1 %320 }
 0x246   :  { %v323_v46 = vmul.f32 %v321_v45, %v301_v22 }
 0x248   :  { %398 = vrot.lane.b32.xlu0 %v323_v46, %s3250_s11 }
 0x2ba   :  { %v399_v49 = vpop.permute.xlu0 %398 }
 0x2bb   :  { %2874 = vmatmul.mubr.msk.f32.vlgmr.msra.gmra.mxu0 %vm41_vm0, %v399_v49  ;;  %2885 = vmatmul.mubr.msk.f32.vlgmr.msra.gmra.mxu1 %vm41_vm0, %v399_v49 }
 0x2bc   :  { %2899 = vmatpush3.msra.mxu1 %v3390_v31  ;;  %2888 = vmatpush3.msra.mxu0 %v3396_v32 }
 0x2bd   :  { %2900 = vmatprep.subr.mxu1 %v3247_v0  ;;  %2889 = vmatprep.subr.mxu0 %v3247_v0 }
 0x2be   :  { %2901 = vmatpush3.msra.mxu1 %v3408_v34  ;;  %2890 = vmatpush3.msra.mxu0 %v3401_v33 }
 0x2bf   :  { %2902 = vmatprep.subr.mxu1 %v3247_v0  ;;  %2891 = vmatprep.subr.mxu0 %v3247_v0 }
 0x2c0   :  { %2903 = vmatpush3.msra.mxu1 %v3437_v39  ;;  %2892 = vmatpush3.msra.mxu0 %v3418_v36 }
 0x2c1   :  { %2904 = vmatprep.subr.mxu1 %v3247_v0  ;;  %2893 = vmatprep.subr.mxu0 %v3247_v0 }
 0x2c2   :  { %2905 = vmatpush3.msra.mxu1 %v3458_v44  ;;  %2906 = vmatprep.mubr.msk.f32.mxu1 %vm3248_vm1, %v3247_v0 }
 0x2c3   :  { %2894 = vmatpush3.msra.mxu0 %v3430_v38  ;;  %2895 = vmatprep.mubr.msk.f32.mxu0 %vm3248_vm1, %v3247_v0 }
 0x2c4   :  { %2909 = vmatprep.subr.mxu0 %v3247_v0  ;;  %2920 = vmatprep.subr.mxu1 %v3247_v0 }
 0x37b   :  { %v468_v58 = vpop.f32.mrf.mxu0  ;;  %v585_v59 = vpop.f32.mrf.mxu1 }
 0x37c   :  { %v469_v60 = vadd.f32 %v468_v58, %v393_v47  ;;  %v589_v61 = vadd.f32 %v585_v59, %v161_v56  ;;  %v166_v58 = vadd.f32 %v3372_v11, %v3500_v51 }
 0x37d   :  { %v2875_v62 = vpop.f32.mrf.mxu0  ;;  %v2886_v63 = vpop.f32.mrf.mxu1 }
 0x37e   :  { %v478_v1 = vadd.f32 %v3515_v57, %v469_v60  ;;  %3143 = vtanh.f32 %v589_v61  ;;  %v590_v9 = vmul.f32 0.5, %v589_v61 }
 0x380   :  { %3145 = vtanh.f32 %v478_v1  ;;  %v479_v10 = vmul.f32 0.5, %v478_v1 }
 0x381   :  { %3147 = vtanh.f32 %v590_v9 }
 0x382   :  { %3149 = vtanh.f32 %v479_v10 }
 0x38b   :  { %v3144_v3 = vpop.eup %3143 }
 0x38c   :  { %597 = vrot.lane.b32.xlu0 %v3144_v3, %s3249_s30 }
 0x38d   :  { %v3146_v5 = vpop.eup %3145 }
 0x38e   :  { %490 = vrot.lane.b32.xlu1 %v3146_v5, %s3249_s30  ;;  %v3148_v12 = vpop.eup %3147 }
 0x38f   :  { %v3150_v13 = vpop.eup %3149  ;;  %v592_v14 = vmul.f32 0.5, %v3148_v12 }
 0x390   :  { %v481_v15 = vmul.f32 0.5, %v3150_v13 }
 0x391   :  { %v593_v16 = vadd.f32 0.5, %v592_v14 }
 0x392   :  { %485 = vrot.lane.b32.xlu1 %v220_v6, %s3250_s11  ;;  %v482_v19 = vadd.f32 0.5, %v481_v15 }
 0x393   :  { %v595_v23 = vmul.f32 %v593_v16, %v3378_v28 }
 0x3fe   :  { %v598_v17 = vpop.permute.xlu0 %597 }
 0x3ff   :  { %v600_v18 = vmul.f32 %v598_v17, %v593_v16 }
 0x400   :  { %v491_v20 = vpop.permute.xlu1 %490 }
 0x401   :  { %v493_v21 = vmul.f32 %v491_v20, %v482_v19  ;;  %602 = vrot.lane.b32.xlu1 %v600_v18, %s3250_s11 }
 0x403   :  { %495 = vrot.lane.b32.xlu0 %v493_v21, %s3250_s11 }
 0x404   :  { %v486_v22 = vpop.permute.xlu1 %485 }
 0x405   :  { %v488_v25 = vmul.f32 %v486_v22, %v482_v19 }
 0x473   :  { %v603_v24 = vpop.permute.xlu1 %602 }
 0x474   :  { %v3524_v26 = vadd.f32 %v603_v24, %v595_v23 }
 0x475   :  { %v496_v27 = vpop.permute.xlu0 %495 }
 0x476   :  { %3151 = vtanh.f32 %v3524_v26  ;;  %v3527_v29 = vadd.f32 %v496_v27, %v488_v25 }
 0x478   :  { %3153 = vtanh.f32 %v3527_v29 }
 0x483   :  { %v3152_v30 = vpop.eup %3151 }
 0x484   :  { %608 = vrot.lane.b32.xlu1 %v3152_v30, %s3249_s30 }
 0x485   :  { %v3154_v35 = vpop.eup %3153 }
 0x486   :  { %501 = vrot.lane.b32.xlu0 %v3154_v35, %s3249_s30 }
 0x4f6   :  { %v609_v37 = vpop.permute.xlu1 %608 }
 0x4f7   :  { %v611_v40 = vmul.f32 %v609_v37, %v593_v16 }
 0x4f8   :  { %v502_v28 = vpop.permute.xlu0 %501 }
 0x4f9   :  { %v3532_v41 = vmul.f32 %v502_v28, %v482_v19  ;;  %688 = vrot.lane.b32.xlu1 %v611_v40, %s3250_s11 }
 0x4fb   :  { %613 = vrot.lane.b32.xlu0 %v3532_v41, %s3250_s11 }
 0x56b   :  { %v689_v42 = vpop.permute.xlu1 %688 }
 0x56c   :  { %2907 = vmatmul.mubr.msk.f32.vlgmr.msra.gmra.mxu1 %vm41_vm0, %v689_v42 }
 0x56d   :  { %v614_v43 = vpop.permute.xlu0 %613  ;;  %2921 = vmatpush3.msra.mxu1 %v3396_v32  ;;  %2928 = vmatprep.mubr.msk.f32.mxu1 %vm3248_vm1, %v3247_v0 }
 0x56e   :  { %2896 = vmatmul.mubr.msk.f32.vlgmr.msra.gmra.mxu0 %vm41_vm0, %v614_v43  ;;  %2922 = vmatprep.subr.mxu1 %v3247_v0 }
 0x56f   :  { %2910 = vmatpush3.msra.mxu0 %v3315_v2  ;;  %2917 = vmatprep.mubr.msk.f32.mxu0 %vm3248_vm1, %v3247_v0 }
 0x570   :  { %2911 = vmatprep.subr.mxu0 %v3247_v0  ;;  %2923 = vmatpush3.msra.mxu1 %v3401_v33 }
 0x571   :  { %2912 = vmatpush3.msra.mxu0 %v3336_v4  ;;  %2924 = vmatprep.subr.mxu1 %v3247_v0 }
 0x572   :  { %2913 = vmatprep.subr.mxu0 %v3247_v0  ;;  %2925 = vmatpush3.msra.mxu1 %v3418_v36 }
 0x573   :  { %2914 = vmatpush3.msra.mxu0 %v3349_v7  ;;  %2926 = vmatprep.subr.mxu1 %v3247_v0 }
 0x574   :  { %2915 = vmatprep.subr.mxu0 %v3247_v0  ;;  %2927 = vmatpush3.msra.mxu1 %v3430_v38 }
 0x575   :  { %2916 = vmatpush3.msra.mxu0 %v3357_v8  ;;  %2942 = vmatprep.subr.mxu1 %v3247_v0 }
 0x576   :  { %2918 = vmatmul.mubr.msk.f32.vlgmr.msra.gmra.mxu0 %vm41_vm0, %v689_v42  ;;  %2931 = vmatprep.subr.mxu0 %v3247_v0  ;;  %v171_v42 = vadd.f32 %v3498_v50, %v3372_v11 }
 0x577   :  { %2932 = vmatpush3.msra.mxu0 %v3390_v31  ;;  %2939 = vmatprep.mubr.msk.f32.mxu0 %vm3248_vm1, %v3247_v0 }
 0x578   :  { %2933 = vmatprep.subr.mxu0 %v3247_v0 }
 0x579   :  { %2934 = vmatpush3.msra.mxu0 %v3408_v34 }
 0x57a   :  { %2935 = vmatprep.subr.mxu0 %v3247_v0 }
 0x57b   :  { %2936 = vmatpush3.msra.mxu0 %v3437_v39 }
 0x57c   :  { %2937 = vmatprep.subr.mxu0 %v3247_v0 }
 0x57d   :  { %2938 = vmatpush3.msra.mxu0 %v3458_v44 }
 0x57e   :  { %2953 = vmatprep.subr.mxu0 %v3247_v0 }
 0x62c   :  { %v758_v45 = vpop.f32.mrf.mxu1 }
 0x62e   :  { %v683_v46 = vpop.f32.mrf.mxu0  ;;  %v2908_v47 = vpop.f32.mrf.mxu1 }
 0x62f   :  { %v759_v48 = vadd.f32 %v758_v45, %v683_v46 }
 0x630   :  { %v2897_v49 = vpop.f32.mrf.mxu0 }
 0x631   :  { %v762_v56 = vadd.f32 %v3515_v57, %v759_v48 }
 0x633   :  { %3155 = vtanh.f32 %v762_v56  ;;  %v763_v1 = vmul.f32 0.5, %v762_v56 }
 0x636   :  { %v862_v59 = vpop.f32.mrf.mxu0 }
 0x637   :  { %v866_v60 = vadd.f32 %v862_v59, %v166_v58 }
 0x638   :  { %v2919_v61 = vpop.f32.mrf.mxu0 }
 0x639   :  { %3157 = vtanh.f32 %v866_v60  ;;  %v867_v3 = vmul.f32 0.5, %v866_v60 }
 0x63a   :  { %3159 = vtanh.f32 %v763_v1 }
 0x63b   :  { %3161 = vtanh.f32 %v867_v3 }
 0x640   :  { %v3156_v62 = vpop.eup %3155 }
 0x641   :  { %770 = vrot.lane.b32.xlu0 %v3156_v62, %s3249_s30 }
 0x646   :  { %v3158_v63 = vpop.eup %3157 }
 0x647   :  { %874 = vrot.lane.b32.xlu1 %v3158_v63, %s3249_s30  ;;  %v3160_v5 = vpop.eup %3159 }
 0x648   :  { %v765_v6 = vmul.f32 0.5, %v3160_v5  ;;  %v3162_v9 = vpop.eup %3161 }
 0x649   :  { %v869_v13 = vmul.f32 0.5, %v3162_v9 }
 0x64a   :  { %v766_v10 = vadd.f32 0.5, %v765_v6 }
 0x64b   :  { %v870_v14 = vadd.f32 0.5, %v869_v13 }
 0x64c   :  { %v768_v17 = vmul.f32 %v766_v10, %v3527_v29 }
 0x64d   :  { %v872_v20 = vmul.f32 %v870_v14, %v3524_v26 }
 0x6b3   :  { %v771_v12 = vpop.permute.xlu0 %770 }
 0x6b4   :  { %v773_v51 = vmul.f32 %v771_v12, %v766_v10 }
 0x6b6   :  { %775 = vrot.lane.b32.xlu0 %v773_v51, %s3250_s11 }
 0x6b9   :  { %v875_v15 = vpop.permute.xlu1 %874 }
 0x6ba   :  { %v877_v16 = vmul.f32 %v875_v15, %v870_v14 }
 0x6bc   :  { %879 = vrot.lane.b32.xlu1 %v877_v16, %s3250_s11 }
 0x728   :  { %v776_v18 = vpop.permute.xlu0 %775 }
 0x729   :  { %v3578_v19 = vadd.f32 %v776_v18, %v768_v17 }
 0x72b   :  { %3163 = vtanh.f32 %v3578_v19 }
 0x72e   :  { %v880_v21 = vpop.permute.xlu1 %879 }
 0x72f   :  { %v3582_v22 = vadd.f32 %v880_v21, %v872_v20 }
 0x731   :  { %3165 = vtanh.f32 %v3582_v22 }
 0x738   :  { %v3164_v23 = vpop.eup %3163 }
 0x739   :  { %781 = vrot.lane.b32.xlu0 %v3164_v23, %s3249_s30 }
 0x73e   :  { %v3166_v24 = vpop.eup %3165 }
 0x73f   :  { %885 = vrot.lane.b32.xlu1 %v3166_v24, %s3249_s30 }
 0x7ab   :  { %v782_v25 = vpop.permute.xlu0 %781 }
 0x7ac   :  { %v3587_v27 = vmul.f32 %v782_v25, %v766_v10 }
 0x7ae   :  { %890 = vrot.lane.b32.xlu0 %v3587_v27, %s3250_s11 }
 0x7b1   :  { %v886_v29 = vpop.permute.xlu1 %885 }
 0x7b2   :  { %v888_v30 = vmul.f32 %v886_v29, %v870_v14 }
 0x7b4   :  { %965 = vrot.lane.b32.xlu1 %v888_v30, %s3250_s11 }
 0x820   :  { %v891_v26 = vpop.permute.xlu0 %890 }
 0x821   :  { %2929 = vmatmul.mubr.msk.f32.vlgmr.msra.gmra.mxu1 %vm41_vm0, %v891_v26 }
 0x822   :  { %2943 = vmatpush3.msra.mxu1 %v3315_v2  ;;  %2950 = vmatprep.mubr.msk.f32.mxu1 %vm3248_vm1, %v3247_v0 }
 0x823   :  { %2944 = vmatprep.subr.mxu1 %v3247_v0 }
 0x824   :  { %2945 = vmatpush3.msra.mxu1 %v3336_v4 }
 0x825   :  { %2946 = vmatprep.subr.mxu1 %v3247_v0 }
 0x826   :  { %2947 = vmatpush3.msra.mxu1 %v3349_v7  ;;  %v966_v35 = vpop.permute.xlu1 %965 }
 0x827   :  { %2940 = vmatmul.mubr.msk.f32.vlgmr.msra.gmra.mxu0 %vm41_vm0, %v966_v35  ;;  %2948 = vmatprep.subr.mxu1 %v3247_v0 }
 0x828   :  { %2949 = vmatpush3.msra.mxu1 %v3357_v8  ;;  %2954 = vmatpush3.msra.mxu0 %v3396_v32 }
 0x829   :  { %2951 = vmatmul.mubr.msk.f32.vlgmr.msra.gmra.mxu1 %vm41_vm0, %v966_v35  ;;  %2964 = vmatprep.subr.mxu1 %v3247_v0 }
 0x82a   :  { %2955 = vmatprep.subr.mxu0 %v3247_v0  ;;  %2965 = vmatpush3.msra.mxu1 %v3390_v31 }
 0x82b   :  { %2956 = vmatpush3.msra.mxu0 %v3401_v33  ;;  %2966 = vmatprep.subr.mxu1 %v3247_v0 }
 0x82c   :  { %2957 = vmatprep.subr.mxu0 %v3247_v0  ;;  %2967 = vmatpush3.msra.mxu1 %v3408_v34 }
 0x82d   :  { %2958 = vmatpush3.msra.mxu0 %v3418_v36  ;;  %2968 = vmatprep.subr.mxu1 %v3247_v0 }
 0x82e   :  { %2959 = vmatprep.subr.mxu0 %v3247_v0  ;;  %2969 = vmatpush3.msra.mxu1 %v3437_v39 }
 0x82f   :  { %2960 = vmatpush3.msra.mxu0 %v3430_v38  ;;  %2970 = vmatprep.subr.mxu1 %v3247_v0 }
 0x830   :  { %2971 = vmatpush3.msra.mxu1 %v3458_v44  ;;  %2972 = vmatprep.mubr.msk.f32.mxu1 %vm3248_vm1, %v3247_v0 }
 0x831   :  { %2961 = vmatprep.mubr.msk.f32.mxu0 %vm3248_vm1, %v3247_v0  ;;  %2975 = vmatprep.subr.mxu0 %v3247_v0 }
 0x832   :  { %2986 = vmatprep.subr.mxu1 %v3247_v0 }
 0x8e1   :  { %v960_v37 = vpop.f32.mrf.mxu1 }
 0x8e3   :  { %v2930_v40 = vpop.f32.mrf.mxu1 }
 0x8e4   :  { %v176_v40 = vadd.f32 %v3372_v11, %v3504_v53 }
 0x8e7   :  { %v1035_v28 = vpop.f32.mrf.mxu0 }
 0x8e8   :  { %v1036_v43 = vadd.f32 %v1035_v28, %v960_v37 }
 0x8e9   :  { %v2941_v45 = vpop.f32.mrf.mxu0  ;;  %v1139_v46 = vpop.f32.mrf.mxu1 }
 0x8ea   :  { %v1039_v47 = vadd.f32 %v3515_v57, %v1036_v43  ;;  %v1143_v48 = vadd.f32 %v1139_v46, %v171_v42 }
 0x8eb   :  { %v2952_v49 = vpop.f32.mrf.mxu1 }
 0x8ec   :  { %3167 = vtanh.f32 %v1039_v47  ;;  %v1040_v59 = vmul.f32 0.5, %v1039_v47  ;;  %v1144_v60 = vmul.f32 0.5, %v1143_v48 }
 0x8ed   :  { %3169 = vtanh.f32 %v1143_v48 }
 0x8ee   :  { %3171 = vtanh.f32 %v1040_v59 }
 0x8ef   :  { %3173 = vtanh.f32 %v1144_v60 }
 0x8f9   :  { %v3168_v56 = vpop.eup %3167 }
 0x8fa   :  { %v3170_v58 = vpop.eup %3169  ;;  %1047 = vrot.lane.b32.xlu0 %v3168_v56, %s3249_s30 }
 0x8fb   :  { %1151 = vrot.lane.b32.xlu1 %v3170_v58, %s3249_s30  ;;  %v3172_v50 = vpop.eup %3171 }
 0x8fc   :  { %v3174_v61 = vpop.eup %3173  ;;  %v1042_v62 = vmul.f32 0.5, %v3172_v50 }
 0x8fd   :  { %v1146_v63 = vmul.f32 0.5, %v3174_v61 }
 0x8fe   :  { %v1043_v1 = vadd.f32 0.5, %v1042_v62 }
 0x8ff   :  { %v1147_v3 = vadd.f32 0.5, %v1146_v63 }
 0x900   :  { %v1045_v12 = vmul.f32 %v1043_v1, %v3578_v19 }
 0x901   :  { %v1149_v51 = vmul.f32 %v1147_v3, %v3582_v22 }
 0x96c   :  { %v1048_v5 = vpop.permute.xlu0 %1047 }
 0x96d   :  { %v1152_v6 = vpop.permute.xlu1 %1151  ;;  %v1050_v9 = vmul.f32 %v1048_v5, %v1043_v1 }
 0x96e   :  { %v1154_v10 = vmul.f32 %v1152_v6, %v1147_v3 }
 0x96f   :  { %1052 = vrot.lane.b32.xlu0 %v1050_v9, %s3250_s11 }
 0x970   :  { %1156 = vrot.lane.b32.xlu1 %v1154_v10, %s3250_s11 }
 0x9e1   :  { %v1053_v13 = vpop.permute.xlu0 %1052 }
 0x9e2   :  { %v1157_v14 = vpop.permute.xlu1 %1156  ;;  %v3634_v15 = vadd.f32 %v1053_v13, %v1045_v12 }
 0x9e3   :  { %v3636_v16 = vadd.f32 %v1157_v14, %v1149_v51 }
 0x9e4   :  { %3175 = vtanh.f32 %v3634_v15 }
 0x9e5   :  { %3177 = vtanh.f32 %v3636_v16 }
 0x9f1   :  { %v3176_v17 = vpop.eup %3175 }
 0x9f2   :  { %v3178_v18 = vpop.eup %3177  ;;  %1058 = vrot.lane.b32.xlu0 %v3176_v17, %s3249_s30 }
 0x9f3   :  { %1162 = vrot.lane.b32.xlu1 %v3178_v18, %s3249_s30 }
 0xa64   :  { %v1059_v20 = vpop.permute.xlu0 %1058 }
 0xa65   :  { %v1163_v19 = vpop.permute.xlu1 %1162  ;;  %v3642_v21 = vmul.f32 %v1059_v20, %v1043_v1  ;;  %v181_v20 = vadd.f32 %v3502_v52, %v3372_v11 }
 0xa66   :  { %v1165_v22 = vmul.f32 %v1163_v19, %v1147_v3 }
 0xa67   :  { %1167 = vrot.lane.b32.xlu0 %v3642_v21, %s3250_s11 }
 0xa68   :  { %1242 = vrot.lane.b32.xlu1 %v1165_v22, %s3250_s11 }
 0xad9   :  { %v1168_v23 = vpop.permute.xlu0 %1167 }
 0xada   :  { %v1243_v24 = vpop.permute.xlu1 %1242  ;;  %2962 = vmatmul.mubr.msk.f32.vlgmr.msra.gmra.mxu0 %vm41_vm0, %v1168_v23 }
 0xadb   :  { %2973 = vmatmul.mubr.msk.f32.vlgmr.msra.gmra.mxu1 %vm41_vm0, %v1243_v24  ;;  %2976 = vmatpush3.msra.mxu0 %v3315_v2 }
 0xadc   :  { %2977 = vmatprep.subr.mxu0 %v3247_v0  ;;  %2983 = vmatprep.mubr.msk.f32.mxu0 %vm3248_vm1, %v3247_v0 }
 0xadd   :  { %2978 = vmatpush3.msra.mxu0 %v3336_v4  ;;  %2987 = vmatpush3.msra.mxu1 %v3396_v32 }
 0xade   :  { %2979 = vmatprep.subr.mxu0 %v3247_v0  ;;  %2988 = vmatprep.subr.mxu1 %v3247_v0 }
 0xadf   :  { %2980 = vmatpush3.msra.mxu0 %v3349_v7  ;;  %2989 = vmatpush3.msra.mxu1 %v3401_v33 }
 0xae0   :  { %2981 = vmatprep.subr.mxu0 %v3247_v0  ;;  %2990 = vmatprep.subr.mxu1 %v3247_v0 }
 0xae1   :  { %2982 = vmatpush3.msra.mxu0 %v3357_v8  ;;  %2991 = vmatpush3.msra.mxu1 %v3418_v36 }
 0xae2   :  { %2984 = vmatmul.mubr.msk.f32.vlgmr.msra.gmra.mxu0 %vm41_vm0, %v1243_v24  ;;  %2992 = vmatprep.subr.mxu1 %v3247_v0 }
 0xae3   :  { %2997 = vmatprep.subr.mxu0 %v3247_v0  ;;  %2993 = vmatpush3.msra.mxu1 %v3430_v38 }
 0xae4   :  { %2998 = vmatpush3.msra.mxu0 %v3390_v31  ;;  %2994 = vmatprep.mubr.msk.f32.mxu1 %vm3248_vm1, %v3247_v0 }
 0xae5   :  { %2999 = vmatprep.subr.mxu0 %v3247_v0  ;;  %3008 = vmatprep.subr.mxu1 %v3247_v0 }
 0xae6   :  { %3000 = vmatpush3.msra.mxu0 %v3408_v34  ;;  %3005 = vmatprep.mubr.msk.f32.mxu0 %vm3248_vm1, %v3247_v0 }
 0xae7   :  { %3001 = vmatprep.subr.mxu0 %v3247_v0 }
 0xae8   :  { %3002 = vmatpush3.msra.mxu0 %v3437_v39 }
 0xae9   :  { %3003 = vmatprep.subr.mxu0 %v3247_v0 }
 0xaea   :  { %3004 = vmatpush3.msra.mxu0 %v3458_v44 }
 0xaeb   :  { %3019 = vmatprep.subr.mxu0 %v3247_v0 }
 0xb9a   :  { %v1237_v25 = vpop.f32.mrf.mxu0 }
 0xb9b   :  { %v1312_v29 = vpop.f32.mrf.mxu1 }
 0xb9c   :  { %v1313_v30 = vadd.f32 %v1312_v29, %v1237_v25  ;;  %v2963_v26 = vpop.f32.mrf.mxu0 }
 0xb9d   :  { %v2974_v35 = vpop.f32.mrf.mxu1 }
 0xb9e   :  { %v1316_v37 = vadd.f32 %v3515_v57, %v1313_v30 }
 0xba0   :  { %3179 = vtanh.f32 %v1316_v37  ;;  %v1317_v47 = vmul.f32 0.5, %v1316_v37 }
 0xba2   :  { %v1416_v28 = vpop.f32.mrf.mxu0 }
 0xba3   :  { %v1420_v42 = vadd.f32 %v1416_v28, %v176_v40 }
 0xba4   :  { %v2985_v43 = vpop.f32.mrf.mxu0 }
 0xba5   :  { %3181 = vtanh.f32 %v1420_v42  ;;  %v1421_v48 = vmul.f32 0.5, %v1420_v42 }
 0xba6   :  { %3183 = vtanh.f32 %v1317_v47 }
 0xba7   :  { %3185 = vtanh.f32 %v1421_v48 }
 0xbad   :  { %v3180_v45 = vpop.eup %3179 }
 0xbae   :  { %1324 = vrot.lane.b32.xlu0 %v3180_v45, %s3249_s30 }
 0xbb2   :  { %v3182_v46 = vpop.eup %3181 }
 0xbb3   :  { %1428 = vrot.lane.b32.xlu1 %v3182_v46, %s3249_s30  ;;  %v3184_v49 = vpop.eup %3183 }
 0xbb4   :  { %v1319_v56 = vmul.f32 0.5, %v3184_v49  ;;  %v3186_v58 = vpop.eup %3185 }
 0xbb5   :  { %v1423_v53 = vmul.f32 0.5, %v3186_v58 }
 0xbb6   :  { %v1320_v59 = vadd.f32 0.5, %v1319_v56 }
 0xbb7   :  { %v1424_v61 = vadd.f32 0.5, %v1423_v53 }
 0xbb8   :  { %v1322_v1 = vmul.f32 %v1320_v59, %v3634_v15 }
 0xbb9   :  { %v1426_v6 = vmul.f32 %v1424_v61, %v3636_v16 }
 0xc20   :  { %v1325_v60 = vpop.permute.xlu0 %1324 }
 0xc21   :  { %v1327_v50 = vmul.f32 %v1325_v60, %v1320_v59 }
 0xc23   :  { %1329 = vrot.lane.b32.xlu0 %v1327_v50, %s3250_s11 }
 0xc25   :  { %v1429_v62 = vpop.permute.xlu1 %1428 }
 0xc26   :  { %v1431_v63 = vmul.f32 %v1429_v62, %v1424_v61 }
 0xc28   :  { %1433 = vrot.lane.b32.xlu1 %v1431_v63, %s3250_s11 }
 0xc95   :  { %v1330_v3 = vpop.permute.xlu0 %1329 }
 0xc96   :  { %v3688_v5 = vadd.f32 %v1330_v3, %v1322_v1 }
 0xc98   :  { %3187 = vtanh.f32 %v3688_v5 }
 0xc9a   :  { %v1434_v9 = vpop.permute.xlu1 %1433 }
 0xc9b   :  { %v3692_v10 = vadd.f32 %v1434_v9, %v1426_v6  ;;  %v3762_v6 = vld [vmem:[%s3987_s3 + $0x18] sm:$0xff]  ;;  %v3771_v9 = vld [vmem:[%s3987_s3 + $0x10] sm:$0xff] }
 0xc9d   :  { %3189 = vtanh.f32 %v3692_v10 }
 0xca5   :  { %v3188_v12 = vpop.eup %3187 }
 0xca6   :  { %1335 = vrot.lane.b32.xlu0 %v3188_v12, %s3249_s30 }
 0xcaa   :  { %v3190_v51 = vpop.eup %3189 }
 0xcab   :  { %1439 = vrot.lane.b32.xlu1 %v3190_v51, %s3249_s30  ;;  %v3814_v51 = vld [vmem:[%s3989_s2] ss:$0 sm:$0xff] }
 0xd18   :  { %v1336_v13 = vpop.permute.xlu0 %1335 }
 0xd19   :  { %v3697_v14 = vmul.f32 %v1336_v13, %v1320_v59 }
 0xd1b   :  { %1444 = vrot.lane.b32.xlu0 %v3697_v14, %s3250_s11 }
 0xd1d   :  { %v1440_v15 = vpop.permute.xlu1 %1439 }
 0xd1e   :  { %v1442_v17 = vmul.f32 %v1440_v15, %v1424_v61 }
 0xd20   :  { %1519 = vrot.lane.b32.xlu1 %v1442_v17, %s3250_s11 }
 0xd8d   :  { %v1445_v16 = vpop.permute.xlu0 %1444 }
 0xd8e   :  { %2995 = vmatmul.mubr.msk.f32.vlgmr.msra.gmra.mxu1 %vm41_vm0, %v1445_v16 }
 0xd8f   :  { %3009 = vmatpush3.msra.mxu1 %v3315_v2  ;;  %3016 = vmatprep.mubr.msk.f32.mxu1 %vm3248_vm1, %v3247_v0 }
 0xd90   :  { %3010 = vmatprep.subr.mxu1 %v3247_v0 }
 0xd91   :  { %3011 = vmatpush3.msra.mxu1 %v3336_v4 }
 0xd92   :  { %3012 = vmatprep.subr.mxu1 %v3247_v0  ;;  %v1520_v18 = vpop.permute.xlu1 %1519 }
 0xd93   :  { %3013 = vmatpush3.msra.mxu1 %v3349_v7  ;;  %3006 = vmatmul.mubr.msk.f32.vlgmr.msra.gmra.mxu0 %vm41_vm0, %v1520_v18 }
 0xd94   :  { %3014 = vmatprep.subr.mxu1 %v3247_v0  ;;  %3020 = vmatpush3.msra.mxu0 %v3396_v32 }
 0xd95   :  { %3015 = vmatpush3.msra.mxu1 %v3357_v8  ;;  %3021 = vmatprep.subr.mxu0 %v3247_v0 }
 0xd96   :  { %3017 = vmatmul.mubr.msk.f32.vlgmr.msra.gmra.mxu1 %vm41_vm0, %v1520_v18  ;;  %3030 = vmatprep.subr.mxu1 %v3247_v0 }
 0xd97   :  { %3031 = vmatpush3.msra.mxu1 %v3390_v31  ;;  %3022 = vmatpush3.msra.mxu0 %v3401_v33 }
 0xd98   :  { %3032 = vmatprep.subr.mxu1 %v3247_v0  ;;  %3023 = vmatprep.subr.mxu0 %v3247_v0 }
 0xd99   :  { %3033 = vmatpush3.msra.mxu1 %v3408_v34  ;;  %3024 = vmatpush3.msra.mxu0 %v3418_v36 }
 0xd9a   :  { %3034 = vmatprep.subr.mxu1 %v3247_v0  ;;  %3025 = vmatprep.subr.mxu0 %v3247_v0 }
 0xd9b   :  { %3035 = vmatpush3.msra.mxu1 %v3437_v39  ;;  %3026 = vmatpush3.msra.mxu0 %v3430_v38 }
 0xd9c   :  { %3036 = vmatprep.subr.mxu1 %v3247_v0  ;;  %3038 = vmatprep.mubr.msk.f32.mxu1 %vm3248_vm1, %v3247_v0 }
 0xd9d   :  { %3037 = vmatpush3.msra.mxu1 %v3458_v44  ;;  %3027 = vmatprep.mubr.msk.f32.mxu0 %vm3248_vm1, %v3247_v0 }
 0xd9e   :  { %3041 = vmatprep.subr.mxu0 %v3247_v0  ;;  %3052 = vmatprep.subr.mxu1 %v3247_v0 }
 0xe4e   :  { %v1514_v2 = vpop.f32.mrf.mxu1 }
 0xe50   :  { %v2996_v4 = vpop.f32.mrf.mxu1 }
 0xe53   :  { %v1589_v7 = vpop.f32.mrf.mxu0 }
 0xe54   :  { %v1590_v8 = vadd.f32 %v1589_v7, %v1514_v2 }
 0xe55   :  { %v3007_v19 = vpop.f32.mrf.mxu0 }
 0xe56   :  { %v1593_v22 = vadd.f32 %v3515_v57, %v1590_v8  ;;  %v1693_v23 = vpop.f32.mrf.mxu1 }
 0xe57   :  { %v1697_v24 = vadd.f32 %v1693_v23, %v181_v20 }
 0xe58   :  { %3191 = vtanh.f32 %v1593_v22  ;;  %v3018_v25 = vpop.f32.mrf.mxu1  ;;  %v1594_v26 = vmul.f32 0.5, %v1593_v22 }
 0xe59   :  { %3193 = vtanh.f32 %v1697_v24  ;;  %v1698_v35 = vmul.f32 0.5, %v1697_v24 }
 0xe5a   :  { %3195 = vtanh.f32 %v1594_v26 }
 0xe5b   :  { %3197 = vtanh.f32 %v1698_v35 }
 0xe65   :  { %v3192_v29 = vpop.eup %3191 }
 0xe66   :  { %v3194_v30 = vpop.eup %3193  ;;  %1601 = vrot.lane.b32.xlu0 %v3192_v29, %s3249_s30 }
 0xe67   :  { %1705 = vrot.lane.b32.xlu1 %v3194_v30, %s3249_s30  ;;  %v3196_v37 = vpop.eup %3195 }
 0xe68   :  { %v3198_v11 = vpop.eup %3197  ;;  %v1596_v52 = vmul.f32 0.5, %v3196_v37 }
 0xe69   :  { %v1700_v40 = vmul.f32 0.5, %v3198_v11 }
 0xe6a   :  { %v1597_v28 = vadd.f32 0.5, %v1596_v52 }
 0xe6b   :  { %v1701_v42 = vadd.f32 0.5, %v1700_v40 }
 0xe6c   :  { %v1599_v48 = vmul.f32 %v1597_v28, %v3688_v5 }
 0xe6d   :  { %v1703_v49 = vmul.f32 %v1701_v42, %v3692_v10  ;;  %v3780_v10 = vld [vmem:[%s3987_s3 + $0x8] sm:$0xff] }
 0xed8   :  { %v1602_v43 = vpop.permute.xlu0 %1601 }
 0xed9   :  { %v1706_v45 = vpop.permute.xlu1 %1705  ;;  %v1604_v46 = vmul.f32 %v1602_v43, %v1597_v28 }
 0xeda   :  { %v1708_v47 = vmul.f32 %v1706_v45, %v1701_v42 }
 0xedb   :  { %1606 = vrot.lane.b32.xlu0 %v1604_v46, %s3250_s11 }
 0xedc   :  { %1710 = vrot.lane.b32.xlu1 %v1708_v47, %s3250_s11 }
 0xf4d   :  { %v1607_v56 = vpop.permute.xlu0 %1606 }
 0xf4e   :  { %v1711_v58 = vpop.permute.xlu1 %1710  ;;  %v3744_v59 = vadd.f32 %v1607_v56, %v1599_v48  ;;  %v3238_v48 = vld [vmem:[%s3991_s5 + $0x18] sm:$0xff]  ;;  %v3240_v56 = vld [vmem:[%s3991_s5 + $0x10] sm:$0xff] }
 0xf4f   :  { %v3746_v60 = vadd.f32 %v1711_v58, %v1703_v49  ;;  %v3239_v49 = vld [vmem:[%s3990_s4 + $0x18] sm:$0xff]  ;;  %v3241_v58 = vld [vmem:[%s3990_s4 + $0x10] sm:$0xff] }
 0xf50   :  { %3199 = vtanh.f32 %v3744_v59 }
 0xf51   :  { %3201 = vtanh.f32 %v3746_v60 }
 0xf5d   :  { %v3200_v53 = vpop.eup %3199 }
 0xf5e   :  { %v3202_v50 = vpop.eup %3201  ;;  %1612 = vrot.lane.b32.xlu0 %v3200_v53, %s3249_s30  ;;  %v3244_v53 = vld [vmem:[%s3991_s5] sm:$0xff] }
 0xf5f   :  { %1716 = vrot.lane.b32.xlu1 %v3202_v50, %s3249_s30  ;;  %v3245_v50 = vld [vmem:[%s3990_s4] sm:$0xff] }
 0xfd0   :  { %v1613_v61 = vpop.permute.xlu0 %1612 }
 0xfd1   :  { %v1717_v62 = vpop.permute.xlu1 %1716  ;;  %v3752_v63 = vmul.f32 %v1613_v61, %v1597_v28 }
 0xfd2   :  { %v1719_v1 = vmul.f32 %v1717_v62, %v1701_v42 }
 0xfd3   :  { %1721 = vrot.lane.b32.xlu0 %v3752_v63, %s3250_s11 }
 0xfd4   :  { %1796 = vrot.lane.b32.xlu1 %v1719_v1, %s3250_s11 }
0x1045   :  { %v1722_v3 = vpop.permute.xlu0 %1721 }
0x1046   :  { %v1797_v5 = vpop.permute.xlu1 %1796  ;;  %3028 = vmatmul.mubr.msk.f32.vlgmr.msra.gmra.mxu0 %vm41_vm0, %v1722_v3 }
0x1047   :  { %3039 = vmatmul.mubr.msk.f32.vlgmr.msra.gmra.mxu1 %vm41_vm0, %v1797_v5  ;;  %3042 = vmatpush3.msra.mxu0 %v3762_v6 }
0x1048   :  { %3043 = vmatprep.subr.mxu0 %v3247_v0  ;;  %3049 = vmatprep.mubr.msk.f32.mxu0 %vm3248_vm1, %v3247_v0 }
0x1049   :  { %3044 = vmatpush3.msra.mxu0 %v3771_v9  ;;  %3053 = vmatpush3.msra.mxu1 %v3396_v32  ;;  %v3789_v32 = vld [vmem:[%s3987_s3] sm:$0xff] }
0x104a   :  { %3045 = vmatprep.subr.mxu0 %v3247_v0  ;;  %3054 = vmatprep.subr.mxu1 %v3247_v0 }
0x104b   :  { %3046 = vmatpush3.msra.mxu0 %v3780_v10  ;;  %3055 = vmatpush3.msra.mxu1 %v3401_v33 }
0x104c   :  { %3047 = vmatprep.subr.mxu0 %v3247_v0  ;;  %3056 = vmatprep.subr.mxu1 %v3247_v0 }
0x104d   :  { %3048 = vmatpush3.msra.mxu0 %v3789_v32  ;;  %3057 = vmatpush3.msra.mxu1 %v3418_v36 }
0x104e   :  { %3050 = vmatmul.mubr.msk.f32.vlgmr.msra.gmra.mxu0 %vm41_vm0, %v1797_v5  ;;  %3058 = vmatprep.subr.mxu1 %v3247_v0  ;;  %v191_v5 = vadd.f32 %v3814_v51, %v3506_v54 }
0x104f   :  { %3063 = vmatprep.subr.mxu0 %v3247_v0  ;;  %3059 = vmatpush3.msra.mxu1 %v3430_v38 }
0x1050   :  { %3064 = vmatpush3.msra.mxu0 %v3390_v31  ;;  %3060 = vmatprep.mubr.msk.f32.mxu1 %vm3248_vm1, %v3247_v0 }
0x1051   :  { %3065 = vmatprep.subr.mxu0 %v3247_v0  ;;  %3074 = vmatprep.subr.mxu1 %v3247_v0 }
0x1052   :  { %3066 = vmatpush3.msra.mxu0 %v3408_v34  ;;  %3071 = vmatprep.mubr.msk.f32.mxu0 %vm3248_vm1, %v3247_v0 }
0x1053   :  { %3067 = vmatprep.subr.mxu0 %v3247_v0 }
0x1054   :  { %3068 = vmatpush3.msra.mxu0 %v3437_v39  ;;  %v186_v39 = vadd.f32 %v3814_v51, %v3508_v55 }
0x1055   :  { %3069 = vmatprep.subr.mxu0 %v3247_v0 }
0x1056   :  { %3070 = vmatpush3.msra.mxu0 %v3458_v44 }
0x1057   :  { %3085 = vmatprep.subr.mxu0 %v3247_v0 }
0x1106   :  { %v1791_v31 = vpop.f32.mrf.mxu0 }
0x1107   :  { %v1866_v33 = vpop.f32.mrf.mxu1 }
0x1108   :  { %v1867_v36 = vadd.f32 %v1866_v33, %v1791_v31  ;;  %v3029_v38 = vpop.f32.mrf.mxu0 }
0x1109   :  { %v3040_v12 = vpop.f32.mrf.mxu1 }
0x110a   :  { %v1870_v34 = vadd.f32 %v3515_v57, %v1867_v36 }
0x110c   :  { %3203 = vtanh.f32 %v1870_v34  ;;  %v1871_v18 = vmul.f32 0.5, %v1870_v34 }
0x110e   :  { %v1970_v13 = vpop.f32.mrf.mxu0 }
0x110f   :  { %v1974_v44 = vadd.f32 %v1970_v13, %v186_v39 }
0x1110   :  { %v3051_v15 = vpop.f32.mrf.mxu0 }
0x1111   :  { %3205 = vtanh.f32 %v1974_v44  ;;  %v1975_v2 = vmul.f32 0.5, %v1974_v44 }
0x1112   :  { %3207 = vtanh.f32 %v1871_v18 }
0x1113   :  { %3209 = vtanh.f32 %v1975_v2 }
0x1119   :  { %v3204_v17 = vpop.eup %3203 }
0x111a   :  { %1878 = vrot.lane.b32.xlu0 %v3204_v17, %s3249_s30 }
0x111e   :  { %v3206_v16 = vpop.eup %3205 }
0x111f   :  { %1982 = vrot.lane.b32.xlu1 %v3206_v16, %s3249_s30  ;;  %v3208_v4 = vpop.eup %3207 }
0x1120   :  { %v1873_v7 = vmul.f32 0.5, %v3208_v4  ;;  %v3210_v8 = vpop.eup %3209 }
0x1121   :  { %v1977_v55 = vmul.f32 0.5, %v3210_v8 }
0x1122   :  { %v1874_v20 = vadd.f32 0.5, %v1873_v7 }
0x1123   :  { %v1978_v23 = vadd.f32 0.5, %v1977_v55 }
0x1124   :  { %v1876_v29 = vmul.f32 %v1874_v20, %v3744_v59  ;;  %v3242_v59 = vld [vmem:[%s3991_s5 + $0x8] sm:$0xff] }
0x1125   :  { %v1980_v35 = vmul.f32 %v1978_v23, %v3746_v60  ;;  %v3243_v60 = vld [vmem:[%s3990_s4 + $0x8] sm:$0xff] }
0x118c   :  { %v1879_v19 = vpop.permute.xlu0 %1878 }
0x118d   :  { %v1881_v22 = vmul.f32 %v1879_v19, %v1874_v20 }
0x118f   :  { %1883 = vrot.lane.b32.xlu0 %v1881_v22, %s3250_s11 }
0x1191   :  { %v1983_v24 = vpop.permute.xlu1 %1982 }
0x1192   :  { %v1985_v25 = vmul.f32 %v1983_v24, %v1978_v23 }
0x1194   :  { %1987 = vrot.lane.b32.xlu1 %v1985_v25, %s3250_s11 }
0x1201   :  { %v1884_v30 = vpop.permute.xlu0 %1883 }
0x1202   :  { %v3823_v26 = vadd.f32 %v1884_v30, %v1876_v29 }
0x1204   :  { %3211 = vtanh.f32 %v3823_v26 }
0x1206   :  { %v1988_v37 = vpop.permute.xlu1 %1987 }
0x1207   :  { %v3827_v11 = vadd.f32 %v1988_v37, %v1980_v35 }
0x1209   :  { %3213 = vtanh.f32 %v3827_v11 }
0x1211   :  { %v3212_v52 = vpop.eup %3211 }
0x1212   :  { %1889 = vrot.lane.b32.xlu0 %v3212_v52, %s3249_s30 }
0x1216   :  { %v3214_v40 = vpop.eup %3213 }
0x1217   :  { %1993 = vrot.lane.b32.xlu1 %v3214_v40, %s3249_s30  ;;  %v3246_v40 = vld [vmem:[%s3992_s6] ss:$0 sm:$0xff]  ;;  %s3252_s6 = smov 96  }
0x1284   :  { %v1890_v28 = vpop.permute.xlu0 %1889 }
0x1285   :  { %v3832_v42 = vmul.f32 %v1890_v28, %v1874_v20 }
0x1287   :  { %1998 = vrot.lane.b32.xlu0 %v3832_v42, %s3250_s11 }
0x1289   :  { %v1994_v43 = vpop.permute.xlu1 %1993 }
0x128a   :  { %v1996_v45 = vmul.f32 %v1994_v43, %v1978_v23  ;;  %v3251_v43 = vmov 0  }
0x128b   :  { %3136 = vset.pattern.permute.xlu1 %v3251_v43  ;;  %3135 = vset.pattern.permute.xlu0 %v3251_v43 }
0x128c   :  { %2073 = vrot.lane.b32.xlu1 %v1996_v45, %s3250_s11  ;;  %v215_v45 = vld [vmem:[%s3993_s7] sm:$0xff] }
0x128d   :  { %vm787_vm3 = vcmp.eq.s32.totalorder %v215_v45, 1  ;;  %vm1064_vm4 = vcmp.eq.s32.totalorder %v215_v45, 2  ;;  %vm1618_vm5 = vcmp.eq.s32.totalorder %v215_v45, 4  ;;  %vm506_vm6 = vcmp.eq.s32.totalorder %v215_v45, 0 }
0x128e   :  { %vm1341_vm7 = vcmp.eq.s32.totalorder %v215_v45, 3  ;;  %vm2449_vm8 = vcmp.eq.s32.totalorder %v215_v45, 7  ;;  %vm1895_vm9 = vcmp.eq.s32.totalorder %v215_v45, 5  ;;  %vm2172_vm10 = vcmp.eq.s32.totalorder %v215_v45, 6 }
0x12f9   :  { %v1999_v46 = vpop.permute.xlu0 %1998 }
0x12fa   :  { %3061 = vmatmul.mubr.msk.f32.vlgmr.msra.gmra.mxu1 %vm41_vm0, %v1999_v46  ;;  %v788_v46 = vsel %vm787_vm3, 1, %v3251_v43 }
0x12fb   :  { %3075 = vmatpush3.msra.mxu1 %v3762_v6  ;;  %3082 = vmatprep.mubr.msk.f32.mxu1 %vm3248_vm1, %v3247_v0 }
0x12fc   :  { %3076 = vmatprep.subr.mxu1 %v3247_v0 }
0x12fd   :  { %3077 = vmatpush3.msra.mxu1 %v3771_v9 }
0x12fe   :  { %3078 = vmatprep.subr.mxu1 %v3247_v0  ;;  %v2074_v47 = vpop.permute.xlu1 %2073 }
0x12ff   :  { %3079 = vmatpush3.msra.mxu1 %v3780_v10  ;;  %3072 = vmatmul.mubr.msk.f32.vlgmr.msra.gmra.mxu0 %vm41_vm0, %v2074_v47 }
0x1300   :  { %3080 = vmatprep.subr.mxu1 %v3247_v0  ;;  %3086 = vmatpush3.msra.mxu0 %v3238_v48  ;;  %v1619_v48 = vsel %vm1618_vm5, 1, %v3251_v43 }
0x1301   :  { %3081 = vmatpush3.msra.mxu1 %v3789_v32  ;;  %3087 = vmatprep.subr.mxu0 %v3247_v0 }
0x1302   :  { %3083 = vmatmul.mubr.msk.f32.vlgmr.msra.gmra.mxu1 %vm41_vm0, %v2074_v47  ;;  %3096 = vmatprep.subr.mxu1 %v3247_v0  ;;  %v1065_v47 = vsel %vm1064_vm4, 1, %v3251_v43  ;;  %vm2644_vm4 = vcmask 1024  }
0x1303   :  { %3097 = vmatpush3.msra.mxu1 %v3239_v49  ;;  %3088 = vmatpush3.msra.mxu0 %v3240_v56  ;;  %v507_v56 = vsel %vm506_vm6, 1, %v3251_v43 }
0x1304   :  { %3098 = vmatprep.subr.mxu1 %v3247_v0  ;;  %3089 = vmatprep.subr.mxu0 %v3247_v0 }
0x1305   :  { %3099 = vmatpush3.msra.mxu1 %v3241_v58  ;;  %3090 = vmatpush3.msra.mxu0 %v3242_v59  ;;  %v1342_v58 = vsel %vm1341_vm7, 1, %v3251_v43  ;;  %v2450_v59 = vsel %vm2449_vm8, 1, %v3251_v43 }
0x1306   :  { %3100 = vmatprep.subr.mxu1 %v3247_v0  ;;  %3091 = vmatprep.subr.mxu0 %v3247_v0 }
0x1307   :  { %3101 = vmatpush3.msra.mxu1 %v3243_v60  ;;  %3104 = vmatprep.mubr.msk.f32.mxu1 %vm3248_vm1, %v3247_v0  ;;  %v1896_v60 = vsel %vm1895_vm9, 1, %v3251_v43 }
0x1308   :  { %3102 = vmatprep.subr.mxu1 %v3247_v0  ;;  %3092 = vmatpush3.msra.mxu0 %v3244_v53  ;;  %v2173_v53 = vsel %vm2172_vm10, 1, %v3251_v43 }
0x1309   :  { %3103 = vmatpush3.msra.mxu1 %v3245_v50  ;;  %3093 = vmatprep.mubr.msk.f32.mxu0 %vm3248_vm1, %v3247_v0 }
0x130a   :  { %3118 = vmatprep.subr.mxu1 %v3247_v0  ;;  %3107 = vmatprep.subr.mxu0 %v3247_v0 }
0x13ba   :  { %v2068_v61 = vpop.f32.mrf.mxu1 }
0x13bc   :  { %v3062_v62 = vpop.f32.mrf.mxu1 }
0x13bf   :  { %v2143_v1 = vpop.f32.mrf.mxu0 }
0x13c0   :  { %v2144_v3 = vadd.f32 %v2143_v1, %v2068_v61 }
0x13c1   :  { %v3073_v6 = vpop.f32.mrf.mxu0 }
0x13c2   :  { %v2147_v9 = vadd.f32 %v3515_v57, %v2144_v3  ;;  %v2247_v10 = vpop.f32.mrf.mxu1  ;;  %v221_v6 = vld [vmem:[#allocation7] sm:$0xff] }
0x13c3   :  { %v2251_v32 = vadd.f32 %v2247_v10, %v191_v5 }
0x13c4   :  { %3215 = vtanh.f32 %v2147_v9  ;;  %v3084_v31 = vpop.f32.mrf.mxu1  ;;  %v2148_v38 = vmul.f32 0.5, %v2147_v9 }
0x13c5   :  { %3217 = vtanh.f32 %v2251_v32  ;;  %v2252_v12 = vmul.f32 0.5, %v2251_v32 }
0x13c6   :  { %3219 = vtanh.f32 %v2148_v38  ;;  %v2483_v38 = vld [vmem:[%s3994_s8 + $0x10] sm:$0xff] }
0x13c7   :  { %3221 = vtanh.f32 %v2252_v12  ;;  %v2487_v12 = vld [vmem:[%s3994_s8 + $0x30] sm:$0xff] }
0x13d1   :  { %v3216_v33 = vpop.eup %3215 }
0x13d2   :  { %v3218_v36 = vpop.eup %3217  ;;  %2155 = vrot.lane.b32.xlu0 %v3216_v33, %s3249_s30  ;;  %v2484_v33 = vld [vmem:[%s3994_s8 + $0x18] sm:$0xff] }
0x13d3   :  { %2259 = vrot.lane.b32.xlu1 %v3218_v36, %s3249_s30  ;;  %v3220_v34 = vpop.eup %3219  ;;  %v2488_v36 = vld [vmem:[%s3994_s8 + $0x38] sm:$0xff] }
0x13d4   :  { %v3222_v54 = vpop.eup %3221  ;;  %v2150_v51 = vmul.f32 0.5, %v3220_v34  ;;  %v2482_v34 = vld [vmem:[%s3994_s8 + $0x8] sm:$0xff] }
0x13d5   :  { %v2254_v39 = vmul.f32 0.5, %v3222_v54  ;;  %v2486_v54 = vld [vmem:[%s3994_s8 + $0x28] sm:$0xff] }
0x13d6   :  { %v2151_v57 = vadd.f32 0.5, %v2150_v51  ;;  %v2481_v51 = vld [vmem:[%s3994_s8] sm:$0xff] }
0x13d7   :  { %v2255_v13 = vadd.f32 0.5, %v2254_v39 }
0x13d8   :  { %v2153_v18 = vmul.f32 %v2151_v57, %v3823_v26 }
0x13d9   :  { %v2257_v2 = vmul.f32 %v2255_v13, %v3827_v11 }
0x1444   :  { %v2156_v44 = vpop.permute.xlu0 %2155 }
0x1445   :  { %v2260_v15 = vpop.permute.xlu1 %2259  ;;  %v2158_v17 = vmul.f32 %v2156_v44, %v2151_v57 }
0x1446   :  { %v2262_v16 = vmul.f32 %v2260_v15, %v2255_v13 }
0x1447   :  { %2160 = vrot.lane.b32.xlu0 %v2158_v17, %s3250_s11 }
0x1448   :  { %2264 = vrot.lane.b32.xlu1 %v2262_v16, %s3250_s11 }
0x14b9   :  { %v2161_v4 = vpop.permute.xlu0 %2160 }
0x14ba   :  { %v2265_v7 = vpop.permute.xlu1 %2264  ;;  %v3895_v8 = vadd.f32 %v2161_v4, %v2153_v18 }
0x14bb   :  { %v3897_v20 = vadd.f32 %v2265_v7, %v2257_v2 }
0x14bc   :  { %3223 = vtanh.f32 %v3895_v8 }
0x14bd   :  { %3225 = vtanh.f32 %v3897_v20 }
0x14c9   :  { %v3224_v19 = vpop.eup %3223 }
0x14ca   :  { %v3226_v55 = vpop.eup %3225  ;;  %2166 = vrot.lane.b32.xlu0 %v3224_v19, %s3249_s30 }
0x14cb   :  { %2270 = vrot.lane.b32.xlu1 %v3226_v55, %s3249_s30 }
0x153c   :  { %v2167_v22 = vpop.permute.xlu0 %2166 }
0x153d   :  { %v2271_v23 = vpop.permute.xlu1 %2270  ;;  %v3903_v24 = vmul.f32 %v2167_v22, %v2151_v57 }
0x153e   :  { %v2273_v25 = vmul.f32 %v2271_v23, %v2255_v13 }
0x153f   :  { %2275 = vrot.lane.b32.xlu0 %v3903_v24, %s3250_s11 }
0x1540   :  { %2350 = vrot.lane.b32.xlu1 %v2273_v25, %s3250_s11 }
0x15b1   :  { %v2276_v29 = vpop.permute.xlu0 %2275 }
0x15b2   :  { %v2351_v30 = vpop.permute.xlu1 %2350  ;;  %3094 = vmatmul.mubr.msk.f32.vlgmr.msra.gmra.mxu0 %vm41_vm0, %v2276_v29 }
0x15b3   :  { %2457 = vst.msk [vmem:[#allocation3] sm:$0xff] %vm41_vm0, %v2351_v30  ;;  %3105 = vmatmul.mubr.msk.f32.vlgmr.msra.gmra.mxu1 %vm41_vm0, %v2351_v30  ;;  %3115 = vmatprep.mubr.msk.f32.mxu0 %vm3248_vm1, %v3247_v0 }
0x15b4   :  { %3126 = vmatprep.mubr.msk.f32.mxu1 %vm3248_vm1, %v3247_v0  ;;  %3119 = vmatpush3.msra.mxu1 %v2484_v33 }
0x15b5   :  { %3120 = vmatprep.subr.mxu1 %v3247_v0  ;;  %3108 = vmatpush3.msra.mxu0 %v2488_v36 }
0x15b6   :  { %3121 = vmatpush3.msra.mxu1 %v2483_v38  ;;  %3109 = vmatprep.subr.mxu0 %v3247_v0 }
0x15b7   :  { %3122 = vmatprep.subr.mxu1 %v3247_v0  ;;  %3110 = vmatpush3.msra.mxu0 %v2487_v12 }
0x15b8   :  { %3123 = vmatpush3.msra.mxu1 %v2482_v34  ;;  %3111 = vmatprep.subr.mxu0 %v3247_v0 }
0x15b9   :  { %3124 = vmatprep.subr.mxu1 %v3247_v0  ;;  %3112 = vmatpush3.msra.mxu0 %v2486_v54 }
0x15ba   :  { %3125 = vmatpush3.msra.mxu1 %v2481_v51  ;;  %3113 = vmatprep.subr.mxu0 %v3247_v0  ;;  %v2485_v0 = vld [vmem:[%s3994_s8 + $0x20] sm:$0xff] }
0x15bb   :  { %3114 = vmatpush3.msra.mxu0 %v2485_v0 }
0x1672   :  { %v2345_v26 = vpop.f32.mrf.mxu0 }
0x1673   :  { %v2420_v35 = vpop.f32.mrf.mxu1 }
0x1674   :  { %v2421_v37 = vadd.f32 %v2420_v35, %v2345_v26  ;;  %v3095_v11 = vpop.f32.mrf.mxu0 }
0x1675   :  { %v3106_v52 = vpop.f32.mrf.mxu1 }
0x1676   :  { %v2424_v28 = vadd.f32 %v3246_v40, %v2421_v37 }
0x1678   :  { %3227 = vtanh.f32 %v2424_v28  ;;  %v2425_v50 = vmul.f32 0.5, %v2424_v28 }
0x167a   :  { %3229 = vtanh.f32 %v2425_v50 }
0x1685   :  { %v3228_v49 = vpop.eup %3227 }
0x1686   :  { %2432 = vrot.lane.b32.xlu0 %v3228_v49, %s3249_s30 }
0x1687   :  { %v3230_v61 = vpop.eup %3229 }
0x1688   :  { %v2427_v62 = vmul.f32 0.5, %v3230_v61 }
0x168a   :  { %509 = vperm.xlu0 %3135, %v507_v56   ;;  %v3922_v1 = vadd.f32 0.5, %v2427_v62 }
0x168c   :  { %v2430_v9 = vmul.f32 %v3922_v1, %v3895_v8 }
0x168e   :  { %1344 = vperm.xlu0 %3135, %v1342_v58  }
0x1692   :  { %1898 = vperm.xlu0 %3135, %v1896_v60  }
0x1696   :  { %2175 = vperm.xlu0 %3135, %v2173_v53  }
0x16f8   :  { %v2433_v3 = vpop.permute.xlu0 %2432 }
0x16f9   :  { %v2435_v5 = vmul.f32 %v2433_v3, %v3922_v1 }
0x16fb   :  { %2437 = vrot.lane.b32.xlu1 %v2435_v5, %s3250_s11 }
0x16ff   :  { %790 = vperm.xlu1 %3136, %v788_v46  }
0x1703   :  { %1067 = vperm.xlu1 %3136, %v1065_v47  }
0x1705   :  { %v510_v44 = vpop.permute.xlu0 %509 }
0x1706   :  { %vm511_vm11 = vcmp.eq.s32.totalorder %v510_v44, 1 }
0x1707   :  { %1621 = vperm.xlu1 %3136, %v1619_v48  }
0x1709   :  { %v1345_v17 = vpop.permute.xlu0 %1344 }
0x170a   :  { %vm1346_vm14 = vcmp.eq.s32.totalorder %v1345_v17, 1 }
0x170b   :  { %513 = vrot.lane.b32.xlu1 %v221_v6, %s3252_s6 }
0x170d   :  { %v1899_v4 = vpop.permute.xlu0 %1898 }
0x170e   :  { %vm1900_vm1 = vcmp.eq.s32.totalorder %v1899_v4, 1 }
0x170f   :  { %2452 = vperm.xlu1 %3136, %v2450_v59  }
0x1711   :  { %v2176_v19 = vpop.permute.xlu0 %2175 }
0x1712   :  { %vm2177_vm2 = vcmp.eq.s32.totalorder %v2176_v19, 1 }
0x176d   :  { %v2438_v10 = vpop.permute.xlu1 %2437 }
0x176e   :  { %v2440_v32 = vadd.f32 %v2438_v10, %v2430_v9 }
0x1770   :  { %3231 = vtanh.f32 %v2440_v32 }
0x177a   :  { %v791_v39 = vpop.permute.xlu1 %790 }
0x177b   :  { %vm792_vm12 = vcmp.eq.s32.totalorder %v791_v39, 1 }
0x177d   :  { %v3232_v31 = vpop.eup %3231 }
0x177e   :  { %2443 = vrot.lane.b32.xlu0 %v3232_v31, %s3249_s30  ;;  %v1068_v57 = vpop.permute.xlu1 %1067 }
0x177f   :  { %vm1069_vm13 = vcmp.eq.s32.totalorder %v1068_v57, 1 }
0x1782   :  { %v1622_v13 = vpop.permute.xlu1 %1621 }
0x1783   :  { %vm1623_vm15 = vcmp.eq.s32.totalorder %v1622_v13, 1 }
0x1786   :  { %v514_v15 = vpop.permute.xlu1 %513 }
0x1787   :  { %v516_v16 = vsel %vm511_vm11, %v3532_v41, %v514_v15 }
0x1788   :  { %v793_v18 = vsel %vm792_vm12, %v3587_v27, %v516_v16 }
0x1789   :  { %v1070_v2 = vsel %vm1069_vm13, %v3642_v21, %v793_v18 }
0x178a   :  { %v1347_v7 = vsel %vm1346_vm14, %v3697_v14, %v1070_v2  ;;  %v2453_v27 = vpop.permute.xlu1 %2452 }
0x178b   :  { %v1624_v8 = vsel %vm1623_vm15, %v3752_v63, %v1347_v7  ;;  %vm2454_vm3 = vcmp.eq.s32.totalorder %v2453_v27, 1 }
0x178c   :  { %v1901_v41 = vsel %vm1900_vm1, %v3832_v42, %v1624_v8 }
0x178d   :  { %v2178_v22 = vsel %vm2177_vm2, %v3903_v24, %v1901_v41 }
0x17f0   :  { %v2444_v55 = vpop.permute.xlu0 %2443 }
0x17f1   :  { %v2446_v21 = vmul.f32 %v2444_v55, %v3922_v1 }
0x17f3   :  { %v2455_v23 = vsel %vm2454_vm3, %v2446_v21, %v2178_v22 }
0x17f4   :  { %2474 = vrot.lane.b32.xlu1 %v2455_v23, %s3250_s11  ;;  %v2489_v25 = vrot.slane %v2455_v23, 2 }
0x17f6   :  { %2490 = vrot.lane.b32.xlu0 %v2489_v25, %s3250_s11 }
0x17f8   :  { %2459 = vrot.lane.b32.xlu1 %v3897_v20, %s3252_s6  ;;  %v15_v20 = vstv %s3995_s9 }
0x17f9   :  { %16 = vst [vmem:[#allocation8] sm:$0x1] %v15_v20 }
0x17fa   :  { %2464 = vrot.lane.b32.xlu0 %v2446_v21, %s3250_s11 }
0x17fc   :  { %2469 = vrot.lane.b32.xlu1 %v2440_v32, %s3252_s6 }
0x1800   :  { %v2686_v35 = vld [vmem:[#allocation8] ss:$0 sm:$0xff] }
0x1866   :  { %v2475_v14 = vpop.permute.xlu1 %2474 }
0x1867   :  { %2477 = vst.msk [vmem:[#allocation7] sm:$0xff] %vm41_vm0, %v2475_v14  ;;  %3127 = vmatmul.mubr.msk.f32.vlgmr.msra.gmra.mxu1 %vm41_vm0, %v2475_v14 }
0x1868   :  { %v2491_v63 = vpop.permute.xlu0 %2490 }
0x1869   :  { %3116 = vmatmul.mubr.msk.f32.vlgmr.msra.gmra.mxu0 %vm41_vm0, %v2491_v63 }
0x186a   :  { %v2460_v42 = vpop.permute.xlu1 %2459 }
0x186b   :  { %2462 = vst.msk [vmem:[#allocation4] sm:$0xff] %vm41_vm0, %v2460_v42 }
0x186c   :  { %v2465_v24 = vpop.permute.xlu0 %2464 }
0x186d   :  { %2467 = vst.msk [vmem:[#allocation5] sm:$0xff] %vm41_vm0, %v2465_v24 }
0x186e   :  { %v2470_v29 = vpop.permute.xlu1 %2469 }
0x186f   :  { %2472 = vst.msk [vmem:[#allocation6] sm:$0xff] %vm41_vm0, %v2470_v29 }
0x1927   :  { %v2632_v30 = vpop.f32.mrf.mxu1 }
0x1929   :  { %v2560_v26 = vpop.f32.mrf.mxu0  ;;  %v3128_v37 = vpop.f32.mrf.mxu1 }
0x192a   :  { %v2633_v11 = vadd.f32 %v2632_v30, %v2560_v26 }
0x192b   :  { %v3117_v52 = vpop.f32.mrf.mxu0 }
0x192c   :  { %v2643_v40 = vadd.f32 %v2686_v35, %v2633_v11 }
0x192e   :  { %2645 = vst.msk [vmem:[%s3996_s10] sm:$0x3] %vm2644_vm4, %v2643_v40 }

</bundles_post_ra>
